<compile_context>
chip_gen: v5e
topology: v5e:2x2
jax: 0.10.0
libtpu: 0.0.40
codegen_flags: <defaults>
</compile_context>

<pallas_src>
import functools

import numpy as np

import jax
import jax.numpy as jnp
from jax import lax
from jax.experimental import pallas as pl
from jax.experimental.pallas import tpu as pltpu


# ----------------------------------------------------------------------------
# Fused generator kernel (single invocation, batch packed into the row dim)
# ----------------------------------------------------------------------------
def _make_kernel(H):
    Hb = H // 2
    f32, bf16 = jnp.float32, jnp.bfloat16

    def kernel(x_ref, w1_ref, wr_ref, b_ref, r2_ref, uh_ref, bott_ref, gen_ref):
        def taps_cat(x, h_period):
            """3 kh-tap slabs of a stride-1 3x3 conv via sublane rolls (XLU) +
            per-image boundary zero masks, concatenated along lanes so the
            whole conv becomes ONE deep-K MXU matmul."""
            m = x.shape[0]
            row = lax.broadcasted_iota(jnp.int32, x.shape, 0) % h_period
            up = jnp.where(row != 0, pltpu.roll(x, 1, axis=0), 0.0)            # x[i-1]
            dn = jnp.where(row != h_period - 1,
                           pltpu.roll(x, m - 1, axis=0), 0.0)                  # x[i+1]
            return jnp.concatenate([up, x, dn], axis=-1).astype(bf16)

        def mm(xcat_bf, w_bf, bidx, act):
            acc = jnp.dot(xcat_bf, w_bf, preferred_element_type=f32) + b_ref[bidx]
            if act == "relu":
                acc = jnp.maximum(acc, 0.0)
            elif act == "tanh":
                acc = jnp.tanh(acc)
            return acc

        x = x_ref[...].astype(f32)                               # (N*H, W*c_in)

        # enc1: 3x3 s1 conv + relu                         -> (N*H, W*ngf)
        h1 = mm(taps_cat(x, H), w1_ref[...], 0, "relu")

        # enc2: 3x3 s2 conv + relu (stride-2 row taps via block-diag 0/1 matmuls)
        h1b = h1.astype(bf16)
        taps2 = [jnp.dot(r2_ref[k], h1b, preferred_element_type=f32).astype(bf16)
                 for k in range(3)]
        h2 = mm(jnp.concatenate(taps2, axis=-1), wr_ref[0], 1, "relu")  # (N*Hb, Wb*2ngf)

        # residual block + skip
        r1 = mm(taps_cat(h2, Hb), wr_ref[1], 2, "relu")
        r2 = mm(taps_cat(r1, Hb), wr_ref[2], 3, "none")
        bott = jnp.maximum(r2 + h2, 0.0)

        # dec1: x2 NN upsample (rows via uh matmul, cols folded into weights) + conv + relu
        up = jnp.dot(uh_ref[...], bott.astype(bf16), preferred_element_type=f32)
        d1 = mm(taps_cat(up, H), wr_ref[3], 4, "relu")           # (N*H, W*ngf)

        # dec2: 3x3 s1 conv + tanh (Cout zero-padded 3->8 for lane-dense store)
        xg = mm(taps_cat(d1, H), wr_ref[4], 5, "tanh")           # (N*H, W*8)

        bott_ref[...] = bott.astype(bott_ref.dtype)              # (N*Hb, 128) unmasked store
        gen_ref[...] = xg.astype(gen_ref.dtype)                  # (N*H, 128)  unmasked store

    return kernel


# ----------------------------------------------------------------------------
# Wrapper-side construction of the banded conv matrices (once, outside jit)
# ----------------------------------------------------------------------------
def _row_taps(h_out, h_in, stride, pad=1, k=3):
    """R[kh, i, r] = 1  iff  r == stride*i + kh - pad is a valid input row."""
    R = np.zeros((k, h_out, h_in), np.float32)
    for kh in range(k):
        for i in range(h_out):
            r = stride * i + kh - pad
            if 0 <= r < h_in:
                R[kh, i, r] = 1.0
    return R


def _col_band(w, w_in, w_out, stride, pad=1):
    """w: (3,3,Cin,Cout) -> banded matrices (3, w_in*Cin, w_out*Cout)."""
    kh_, kw_, cin, cout = w.shape
    P = np.zeros((kw_, w_in, w_out), np.float32)
    for kw in range(kw_):
        for wo in range(w_out):
            wi = stride * wo + kw - pad
            if 0 <= wi < w_in:
                P[kw, wi, wo] = 1.0
    Wm = jnp.einsum("kxv,hkco->hxcvo", jnp.asarray(P), w)
    return Wm.reshape(kh_, w_in * cin, w_out * cout)


def build_generator_plan(params, N, H=16, W=16, c_in=3, ngf=8):
    """Precompute stacked, MXU-friendly weight operands for a fixed batch N."""
    bf16, f32 = jnp.bfloat16, jnp.float32
    Hb, Wb = H // 2, W // 2
    C2 = 2 * ngf
    c_pad = 8  # dec2 Cout padded 3->8 so the x_gen slab is exactly 128 lanes

    def stack_w(w, w_in, w_out, stride):
        Wm = _col_band(w, w_in, w_out, stride)        # (3, w_in*cin, w_out*cout)
        return Wm.reshape(-1, Wm.shape[-1]).astype(bf16)

    def bias_row(b, w_out):
        return jnp.tile(b, (w_out,)).reshape(1, -1).astype(f32)

    w_e1, b_e1 = params["enc1"]
    w_e2, b_e2 = params["enc2"]
    w_r1, b_r1 = params["res1"]
    w_r2, b_r2 = params["res2"]
    w_d1, b_d1 = params["dec1"]
    w_d2, b_d2 = params["dec2"]

    # dec2: zero-pad output channels (weights + bias) -> padded output lanes are 0.
    w_d2p = jnp.pad(w_d2, ((0, 0), (0, 0), (0, 0), (0, c_pad - w_d2.shape[-1])))
    b_d2p = jnp.pad(b_d2, ((0, c_pad - b_d2.shape[0]),))

    # enc1 weight kept separate (K = 3*W*c_in = 144, the others are all 384).
    w1 = stack_w(w_e1, W, W, 1)                                   # (144, W*ngf)

    # dec1: fold the x2 nearest-neighbour W-upsample into the banded weights.
    Wm_d1 = _col_band(w_d1, W, W, 1)                              # (3, W*C2, W*ngf)
    U_w = np.zeros((Wb * C2, W * C2), np.float32)
    for w2 in range(W):
        for c in range(C2):
            U_w[(w2 // 2) * C2 + c, w2 * C2 + c] = 1.0
    Wm_d1 = jnp.einsum("pq,kqn->kpn", jnp.asarray(U_w), Wm_d1)    # (3, Wb*C2, W*ngf)
    w_d1_stk = Wm_d1.reshape(-1, Wm_d1.shape[-1]).astype(bf16)

    wr = jnp.stack([
        stack_w(w_e2, W, Wb, 2),      # enc2  (3*W*ngf,  Wb*C2)
        stack_w(w_r1, Wb, Wb, 1),     # res1  (3*Wb*C2,  Wb*C2)
        stack_w(w_r2, Wb, Wb, 1),     # res2
        w_d1_stk,                     # dec1  (3*Wb*C2,  W*ngf)
        stack_w(w_d2p, W, W, 1),      # dec2  (3*W*ngf,  W*c_pad)
    ])                                                            # (5, 384, 128) bf16

    b_all = jnp.stack([
        bias_row(b_e1, W), bias_row(b_e2, Wb), bias_row(b_r1, Wb),
        bias_row(b_r2, Wb), bias_row(b_d1, W), bias_row(b_d2p, W),
    ])                                                            # (6, 1, 128) f32

    # enc2 stride-2 row taps: block-diagonal 0/1 matrices over the packed batch.
    R2 = _row_taps(Hb, H, 2)                                      # (3, Hb, H)
    eye_n = np.eye(N, dtype=np.float32)
    r_enc2 = jnp.asarray(
        np.stack([np.kron(eye_n, R2[k]) for k in range(3)])
    ).astype(bf16)                                                # (3, N*Hb, N*H)

    # dec1 nearest-neighbour H-upsample, block-diagonal over the packed batch.
    Uh = np.zeros((H, Hb), np.float32)
    for i in range(H):
        Uh[i, i // 2] = 1.0
    u_h = jnp.asarray(np.kron(eye_n, Uh)).astype(bf16)            # (N*H, N*Hb)

    return dict(w1=w1, wr=wr, b_all=b_all, r_enc2=r_enc2, u_h=u_h,
                N=N, H=H, W=W, c_in=c_in, ngf=ngf, c_pad=c_pad)


# ----------------------------------------------------------------------------
# GAN.forward: (bottleneck, x_gen) = netG(x)    [inference path only]
# ----------------------------------------------------------------------------
def gan_forward(plan, x_nchw):
    N, H, W = plan["N"], plan["H"], plan["W"]
    c_in, ngf, c_pad = plan["c_in"], plan["ngf"], plan["c_pad"]
    Hb, Wb, C2 = H // 2, W // 2, 2 * ngf
    assert x_nchw.shape == (N, c_in, H, W), x_nchw.shape

    # NCHW -> batch-packed lane-dense slab (N*H, W*c_in)  [input layout glue only]
    x_slab = jnp.transpose(x_nchw, (0, 2, 3, 1)).reshape(N * H, W * c_in)
    x_slab = x_slab.astype(jnp.float32)

    kernel = _make_kernel(H)

    # Advisory cost estimate (the 10 MXU matmuls + tanh transcendentals).
    M_full, M_half = N * H, N * Hb
    mm_shapes = [
        (M_full, 3 * W * c_in, W * ngf),                          # enc1
        (M_half, N * H, W * ngf), (M_half, N * H, W * ngf),
        (M_half, N * H, W * ngf),                                 # enc2 row taps
        (M_half, 3 * W * ngf, Wb * C2),                           # enc2
        (M_half, 3 * Wb * C2, Wb * C2),                           # res1
        (M_half, 3 * Wb * C2, Wb * C2),                           # res2
        (M_full, N * Hb, Wb * C2),                                # dec1 upsample
        (M_full, 3 * Wb * C2, W * ngf),                           # dec1
        (M_full, 3 * W * ngf, W * c_pad),                         # dec2
    ]
    flops = sum(2 * m * k * n for (m, k, n) in mm_shapes)
    bytes_accessed = (
        x_slab.size * x_slab.dtype.itemsize
        + sum(int(plan[k].size) * plan[k].dtype.itemsize
              for k in ("w1", "wr", "b_all", "r_enc2", "u_h"))
        + (M_half * Wb * C2 + M_full * W * c_pad) * 4)
    cost = pl.CostEstimate(flops=int(flops),
                           transcendentals=int(M_full * W * c_pad),
                           bytes_accessed=int(bytes_accessed))

    bott_slab, gen_slab = pl.pallas_call(
        kernel,
        out_shape=(jax.ShapeDtypeStruct((M_half, Wb * C2), jnp.float32),
                   jax.ShapeDtypeStruct((M_full, W * c_pad), jnp.float32)),
        cost_estimate=cost,
    )(x_slab, plan["w1"], plan["wr"], plan["b_all"], plan["r_enc2"], plan["u_h"])

    # slabs -> PyTorch NCHW  [output layout glue only; drop dec2 lane padding]
    bottleneck = jnp.transpose(bott_slab.reshape(N, Hb, Wb, C2), (0, 3, 1, 2))
    x_gen = jnp.transpose(gen_slab.reshape(N, H, W, c_pad)[..., :c_in], (0, 3, 1, 2))
    return bottleneck, x_gen


# ----------------------------------------------------------------------------
# Deterministic parameter init (synthetic weights, no checkpoint load)
# ----------------------------------------------------------------------------
def init_generator_params(key, c_in=3, ngf=8):
    ks = jax.random.split(key, 6)

    def conv_p(k, cin, cout):
        k1, k2 = jax.random.split(k)
        fan = 9.0 * cin
        w = jax.random.normal(k1, (3, 3, cin, cout), jnp.float32) / jnp.sqrt(fan)
        b = jax.random.normal(k2, (cout,), jnp.float32) * 0.01
        return w, b

    return {
        "enc1": conv_p(ks[0], c_in, ngf),
        "enc2": conv_p(ks[1], ngf, 2 * ngf),
        "res1": conv_p(ks[2], 2 * ngf, 2 * ngf),
        "res2": conv_p(ks[3], 2 * ngf, 2 * ngf),
        "dec1": conv_p(ks[4], 2 * ngf, ngf),
        "dec2": conv_p(ks[5], ngf, c_in),
    }


# ----------------------------------------------------------------------------
# Pure-XLA f32 reference (independent math path; validates rolls / band folds)
# ----------------------------------------------------------------------------
def _conv3x3_ref(x, w, b, stride=1):
    out = jax.lax.conv_general_dilated(
        x, w, window_strides=(stride, stride), padding=((1, 1), (1, 1)),
        dimension_numbers=("NHWC", "HWIO", "NHWC"),
        precision=jax.lax.Precision.HIGHEST)
    return out + b


def generator_reference(params, x_nchw):
    x = jnp.transpose(x_nchw, (0, 2, 3, 1)).astype(jnp.float32)
    h1 = jax.nn.relu(_conv3x3_ref(x, *params["enc1"]))
    h2 = jax.nn.relu(_conv3x3_ref(h1, *params["enc2"], stride=2))
    r1 = jax.nn.relu(_conv3x3_ref(h2, *params["res1"]))
    r2 = _conv3x3_ref(r1, *params["res2"])
    bott = jax.nn.relu(r2 + h2)
    up = jnp.repeat(jnp.repeat(bott, 2, axis=1), 2, axis=2)
    d1 = jax.nn.relu(_conv3x3_ref(up, *params["dec1"]))
    xg = jnp.tanh(_conv3x3_ref(d1, *params["dec2"]))
    return jnp.transpose(bott, (0, 3, 1, 2)), jnp.transpose(xg, (0, 3, 1, 2))


if __name__ == "__main__":
    key = jax.random.PRNGKey(0)
    kp, kx = jax.random.split(key)

    N, c_in, H, W, ngf = 2, 3, 16, 16, 8
    params = init_generator_params(kp, c_in=c_in, ngf=ngf)
    x = jax.random.normal(kx, (N, c_in, H, W), jnp.float32)   # NCHW, like PyTorch

    plan = build_generator_plan(params, N=N, H=H, W=W, c_in=c_in, ngf=ngf)
    fwd = jax.jit(functools.partial(gan_forward, plan))
    bottleneck, x_gen = fwd(x)
    jax.block_until_ready((bottleneck, x_gen))

    assert x_gen.shape == x.shape, x_gen.shape
    assert bottleneck.shape == (N, 2 * ngf, H // 2, W // 2), bottleneck.shape
    assert bool(jnp.all(jnp.isfinite(x_gen)))
    assert bool(jnp.all(jnp.isfinite(bottleneck)))

    # Correctness vs an independent plain-XLA f32 reference (kernel matmuls use
    # bf16 operands -> one rounding per layer, hence the loose normalized tol).
    bott_r, xgen_r = generator_reference(params, x)

    def nerr(a, b):
        return float(jnp.max(jnp.abs(a - b)) / (jnp.max(jnp.abs(b)) + 1e-6))

    assert nerr(bottleneck, bott_r) < 0.1, nerr(bottleneck, bott_r)
    assert nerr(x_gen, xgen_r) < 0.1, nerr(x_gen, xgen_r)

    print("KERNEL_OK")
</pallas_src>

<mosaic_0001>
module attributes {stable_mosaic.version = 11 : i64} {
  func.func @kernel(%arg0: memref<32x48xf32, #tpu.memory_space<vmem>>, %arg1: memref<144x128xbf16, #tpu.memory_space<vmem>>, %arg2: memref<5x384x128xbf16, #tpu.memory_space<vmem>>, %arg3: memref<6x1x128xf32, #tpu.memory_space<vmem>>, %arg4: memref<3x16x32xbf16, #tpu.memory_space<vmem>>, %arg5: memref<32x16xbf16, #tpu.memory_space<vmem>>, %arg6: memref<16x128xf32, #tpu.memory_space<vmem>>, %arg7: memref<32x128xf32, #tpu.memory_space<vmem>>) attributes {dimension_semantics = [], scalar_prefetch = 0 : i64, scratch_operands = 0 : i64, tpu.core_type = #tpu.core_type<tc>} {
    %c0 = arith.constant 0 : index
    %c0_0 = arith.constant 0 : index
    %0 = vector.load %arg0[%c0, %c0_0] : memref<32x48xf32, #tpu.memory_space<vmem>>, vector<32x48xf32>
    %1 = tpu.iota {dimensions = array<i32: 0>} : vector<32x48xi32>
    %c16_i32 = arith.constant 16 : i32
    %c0_i32 = arith.constant 0 : i32
    %2 = arith.cmpi eq, %c16_i32, %c0_i32 : i32
    %c1_i32 = arith.constant 1 : i32
    %3 = arith.select %2, %c1_i32, %c16_i32 : i32
    %4 = vector.broadcast %3 : i32 to vector<32x48xi32>
    %5 = arith.remsi %1, %4 : vector<32x48xi32>
    %c0_i32_1 = arith.constant 0 : i32
    %6 = vector.broadcast %c0_i32_1 : i32 to vector<32x48xi32>
    %7 = arith.cmpi ne, %5, %6 : vector<32x48xi32>
    %c0_i32_2 = arith.constant 0 : i32
    %8 = vector.broadcast %c0_i32_2 : i32 to vector<32x48xi32>
    %9 = arith.cmpi slt, %5, %8 : vector<32x48xi32>
    %c0_i32_3 = arith.constant 0 : i32
    %10 = arith.cmpi slt, %3, %c0_i32_3 : i32
    %11 = vector.broadcast %10 : i1 to vector<32x48xi1>
    %12 = vector.broadcast %11 : vector<32x48xi1> to vector<32x48xi1>
    %13 = arith.xori %9, %12 : vector<32x48xi1>
    %14 = arith.andi %13, %7 : vector<32x48xi1>
    %15 = vector.broadcast %3 : i32 to vector<32x48xi32>
    %16 = arith.addi %5, %15 : vector<32x48xi32>
    %17 = arith.select %14, %16, %5 : vector<32x48xi1>, vector<32x48xi32>
    %c0_i32_4 = arith.constant 0 : i32
    %18 = vector.broadcast %c0_i32_4 : i32 to vector<32x48xi32>
    %19 = arith.cmpi ne, %17, %18 : vector<32x48xi32>
    %c1_i32_5 = arith.constant 1 : i32
    %20 = tpu.dynamic_rotate %0 by %c1_i32_5 dim 0 : vector<32x48xf32>, i32 -> vector<32x48xf32>
    %cst = arith.constant 0.000000e+00 : f32
    %21 = vector.broadcast %cst : f32 to vector<32x48xf32>
    %22 = arith.select %19, %20, %21 : vector<32x48xi1>, vector<32x48xf32>
    %c15_i32 = arith.constant 15 : i32
    %23 = vector.broadcast %c15_i32 : i32 to vector<32x48xi32>
    %24 = arith.cmpi ne, %17, %23 : vector<32x48xi32>
    %c31_i32 = arith.constant 31 : i32
    %25 = tpu.dynamic_rotate %0 by %c31_i32 dim 0 : vector<32x48xf32>, i32 -> vector<32x48xf32>
    %cst_6 = arith.constant 0.000000e+00 : f32
    %26 = vector.broadcast %cst_6 : f32 to vector<32x48xf32>
    %27 = arith.select %24, %25, %26 : vector<32x48xi1>, vector<32x48xf32>
    %28 = tpu.concatenate %22, %0, %27 in 1 : vector<32x48xf32>, vector<32x48xf32>, vector<32x48xf32> -> vector<32x144xf32>
    %29 = arith.truncf %28 : vector<32x144xf32> to vector<32x144xbf16>
    %c0_7 = arith.constant 0 : index
    %c0_8 = arith.constant 0 : index
    %30 = vector.load %arg1[%c0_7, %c0_8] : memref<144x128xbf16, #tpu.memory_space<vmem>>, vector<144x128xbf16>
    %cst_9 = arith.constant dense<0.000000e+00> : vector<32x128xf32>
    %31 = tpu.matmul %29, %30, %cst_9 {dimension_numbers = #tpu.dot_dimension_numbers<[1], [0], [0], [1], [0, 0, 1, 1], [], []>} : vector<32x144xbf16>, vector<144x128xbf16>, vector<32x128xf32> -> vector<32x128xf32>
    %c0_10 = arith.constant 0 : index
    %c0_11 = arith.constant 0 : index
    %c0_12 = arith.constant 0 : index
    %32 = vector.load %arg3[%c0_10, %c0_11, %c0_12] : memref<6x1x128xf32, #tpu.memory_space<vmem>>, vector<1x1x128xf32>
    %33 = vector.shape_cast %32 : vector<1x1x128xf32> to vector<1x128xf32>
    %34 = vector.broadcast %33 : vector<1x128xf32> to vector<32x128xf32>
    %35 = arith.addf %31, %34 : vector<32x128xf32>
    %cst_13 = arith.constant 0.000000e+00 : f32
    %36 = vector.broadcast %cst_13 : f32 to vector<32x128xf32>
    %37 = arith.maximumf %35, %36 : vector<32x128xf32>
    %38 = arith.truncf %37 : vector<32x128xf32> to vector<32x128xbf16>
    %c0_14 = arith.constant 0 : index
    %c0_15 = arith.constant 0 : index
    %c0_16 = arith.constant 0 : index
    %39 = vector.load %arg4[%c0_14, %c0_15, %c0_16] : memref<3x16x32xbf16, #tpu.memory_space<vmem>>, vector<1x16x32xbf16>
    %40 = vector.shape_cast %39 : vector<1x16x32xbf16> to vector<16x32xbf16>
    %cst_17 = arith.constant dense<0.000000e+00> : vector<16x128xf32>
    %41 = tpu.matmul %40, %38, %cst_17 {dimension_numbers = #tpu.dot_dimension_numbers<[1], [0], [0], [1], [0, 0, 1, 1], [], []>} : vector<16x32xbf16>, vector<32x128xbf16>, vector<16x128xf32> -> vector<16x128xf32>
    %42 = arith.truncf %41 : vector<16x128xf32> to vector<16x128xbf16>
    %c1 = arith.constant 1 : index
    %c0_18 = arith.constant 0 : index
    %c0_19 = arith.constant 0 : index
    %43 = vector.load %arg4[%c1, %c0_18, %c0_19] : memref<3x16x32xbf16, #tpu.memory_space<vmem>>, vector<1x16x32xbf16>
    %44 = vector.shape_cast %43 : vector<1x16x32xbf16> to vector<16x32xbf16>
    %cst_20 = arith.constant dense<0.000000e+00> : vector<16x128xf32>
    %45 = tpu.matmul %44, %38, %cst_20 {dimension_numbers = #tpu.dot_dimension_numbers<[1], [0], [0], [1], [0, 0, 1, 1], [], []>} : vector<16x32xbf16>, vector<32x128xbf16>, vector<16x128xf32> -> vector<16x128xf32>
    %46 = arith.truncf %45 : vector<16x128xf32> to vector<16x128xbf16>
    %c2 = arith.constant 2 : index
    %c0_21 = arith.constant 0 : index
    %c0_22 = arith.constant 0 : index
    %47 = vector.load %arg4[%c2, %c0_21, %c0_22] : memref<3x16x32xbf16, #tpu.memory_space<vmem>>, vector<1x16x32xbf16>
    %48 = vector.shape_cast %47 : vector<1x16x32xbf16> to vector<16x32xbf16>
    %cst_23 = arith.constant dense<0.000000e+00> : vector<16x128xf32>
    %49 = tpu.matmul %48, %38, %cst_23 {dimension_numbers = #tpu.dot_dimension_numbers<[1], [0], [0], [1], [0, 0, 1, 1], [], []>} : vector<16x32xbf16>, vector<32x128xbf16>, vector<16x128xf32> -> vector<16x128xf32>
    %50 = arith.truncf %49 : vector<16x128xf32> to vector<16x128xbf16>
    %51 = tpu.concatenate %42, %46, %50 in 1 : vector<16x128xbf16>, vector<16x128xbf16>, vector<16x128xbf16> -> vector<16x384xbf16>
    %c0_24 = arith.constant 0 : index
    %c0_25 = arith.constant 0 : index
    %c0_26 = arith.constant 0 : index
    %52 = vector.load %arg2[%c0_24, %c0_25, %c0_26] : memref<5x384x128xbf16, #tpu.memory_space<vmem>>, vector<1x384x128xbf16>
    %53 = vector.shape_cast %52 : vector<1x384x128xbf16> to vector<384x128xbf16>
    %cst_27 = arith.constant dense<0.000000e+00> : vector<16x128xf32>
    %54 = tpu.matmul %51, %53, %cst_27 {dimension_numbers = #tpu.dot_dimension_numbers<[1], [0], [0], [1], [0, 0, 1, 1], [], []>} : vector<16x384xbf16>, vector<384x128xbf16>, vector<16x128xf32> -> vector<16x128xf32>
    %c1_28 = arith.constant 1 : index
    %c0_29 = arith.constant 0 : index
    %c0_30 = arith.constant 0 : index
    %55 = vector.load %arg3[%c1_28, %c0_29, %c0_30] : memref<6x1x128xf32, #tpu.memory_space<vmem>>, vector<1x1x128xf32>
    %56 = vector.shape_cast %55 : vector<1x1x128xf32> to vector<1x128xf32>
    %57 = vector.broadcast %56 : vector<1x128xf32> to vector<16x128xf32>
    %58 = arith.addf %54, %57 : vector<16x128xf32>
    %cst_31 = arith.constant 0.000000e+00 : f32
    %59 = vector.broadcast %cst_31 : f32 to vector<16x128xf32>
    %60 = arith.maximumf %58, %59 : vector<16x128xf32>
    %61 = tpu.iota {dimensions = array<i32: 0>} : vector<16x128xi32>
    %c8_i32 = arith.constant 8 : i32
    %c0_i32_32 = arith.constant 0 : i32
    %62 = arith.cmpi eq, %c8_i32, %c0_i32_32 : i32
    %c1_i32_33 = arith.constant 1 : i32
    %63 = arith.select %62, %c1_i32_33, %c8_i32 : i32
    %64 = vector.broadcast %63 : i32 to vector<16x128xi32>
    %65 = arith.remsi %61, %64 : vector<16x128xi32>
    %c0_i32_34 = arith.constant 0 : i32
    %66 = vector.broadcast %c0_i32_34 : i32 to vector<16x128xi32>
    %67 = arith.cmpi ne, %65, %66 : vector<16x128xi32>
    %c0_i32_35 = arith.constant 0 : i32
    %68 = vector.broadcast %c0_i32_35 : i32 to vector<16x128xi32>
    %69 = arith.cmpi slt, %65, %68 : vector<16x128xi32>
    %c0_i32_36 = arith.constant 0 : i32
    %70 = arith.cmpi slt, %63, %c0_i32_36 : i32
    %71 = vector.broadcast %70 : i1 to vector<16x128xi1>
    %72 = vector.broadcast %71 : vector<16x128xi1> to vector<16x128xi1>
    %73 = arith.xori %69, %72 : vector<16x128xi1>
    %74 = arith.andi %73, %67 : vector<16x128xi1>
    %75 = vector.broadcast %63 : i32 to vector<16x128xi32>
    %76 = arith.addi %65, %75 : vector<16x128xi32>
    %77 = arith.select %74, %76, %65 : vector<16x128xi1>, vector<16x128xi32>
    %c0_i32_37 = arith.constant 0 : i32
    %78 = vector.broadcast %c0_i32_37 : i32 to vector<16x128xi32>
    %79 = arith.cmpi ne, %77, %78 : vector<16x128xi32>
    %c1_i32_38 = arith.constant 1 : i32
    %80 = tpu.dynamic_rotate %60 by %c1_i32_38 dim 0 : vector<16x128xf32>, i32 -> vector<16x128xf32>
    %cst_39 = arith.constant 0.000000e+00 : f32
    %81 = vector.broadcast %cst_39 : f32 to vector<16x128xf32>
    %82 = arith.select %79, %80, %81 : vector<16x128xi1>, vector<16x128xf32>
    %c7_i32 = arith.constant 7 : i32
    %83 = vector.broadcast %c7_i32 : i32 to vector<16x128xi32>
    %84 = arith.cmpi ne, %77, %83 : vector<16x128xi32>
    %c15_i32_40 = arith.constant 15 : i32
    %85 = tpu.dynamic_rotate %60 by %c15_i32_40 dim 0 : vector<16x128xf32>, i32 -> vector<16x128xf32>
    %cst_41 = arith.constant 0.000000e+00 : f32
    %86 = vector.broadcast %cst_41 : f32 to vector<16x128xf32>
    %87 = arith.select %84, %85, %86 : vector<16x128xi1>, vector<16x128xf32>
    %88 = tpu.concatenate %82, %60, %87 in 1 : vector<16x128xf32>, vector<16x128xf32>, vector<16x128xf32> -> vector<16x384xf32>
    %89 = arith.truncf %88 : vector<16x384xf32> to vector<16x384xbf16>
    %c1_42 = arith.constant 1 : index
    %c0_43 = arith.constant 0 : index
    %c0_44 = arith.constant 0 : index
    %90 = vector.load %arg2[%c1_42, %c0_43, %c0_44] : memref<5x384x128xbf16, #tpu.memory_space<vmem>>, vector<1x384x128xbf16>
    %91 = vector.shape_cast %90 : vector<1x384x128xbf16> to vector<384x128xbf16>
    %cst_45 = arith.constant dense<0.000000e+00> : vector<16x128xf32>
    %92 = tpu.matmul %89, %91, %cst_45 {dimension_numbers = #tpu.dot_dimension_numbers<[1], [0], [0], [1], [0, 0, 1, 1], [], []>} : vector<16x384xbf16>, vector<384x128xbf16>, vector<16x128xf32> -> vector<16x128xf32>
    %c2_46 = arith.constant 2 : index
    %c0_47 = arith.constant 0 : index
    %c0_48 = arith.constant 0 : index
    %93 = vector.load %arg3[%c2_46, %c0_47, %c0_48] : memref<6x1x128xf32, #tpu.memory_space<vmem>>, vector<1x1x128xf32>
    %94 = vector.shape_cast %93 : vector<1x1x128xf32> to vector<1x128xf32>
    %95 = vector.broadcast %94 : vector<1x128xf32> to vector<16x128xf32>
    %96 = arith.addf %92, %95 : vector<16x128xf32>
    %cst_49 = arith.constant 0.000000e+00 : f32
    %97 = vector.broadcast %cst_49 : f32 to vector<16x128xf32>
    %98 = arith.maximumf %96, %97 : vector<16x128xf32>
    %99 = tpu.iota {dimensions = array<i32: 0>} : vector<16x128xi32>
    %c8_i32_50 = arith.constant 8 : i32
    %c0_i32_51 = arith.constant 0 : i32
    %100 = arith.cmpi eq, %c8_i32_50, %c0_i32_51 : i32
    %c1_i32_52 = arith.constant 1 : i32
    %101 = arith.select %100, %c1_i32_52, %c8_i32_50 : i32
    %102 = vector.broadcast %101 : i32 to vector<16x128xi32>
    %103 = arith.remsi %99, %102 : vector<16x128xi32>
    %c0_i32_53 = arith.constant 0 : i32
    %104 = vector.broadcast %c0_i32_53 : i32 to vector<16x128xi32>
    %105 = arith.cmpi ne, %103, %104 : vector<16x128xi32>
    %c0_i32_54 = arith.constant 0 : i32
    %106 = vector.broadcast %c0_i32_54 : i32 to vector<16x128xi32>
    %107 = arith.cmpi slt, %103, %106 : vector<16x128xi32>
    %c0_i32_55 = arith.constant 0 : i32
    %108 = arith.cmpi slt, %101, %c0_i32_55 : i32
    %109 = vector.broadcast %108 : i1 to vector<16x128xi1>
    %110 = vector.broadcast %109 : vector<16x128xi1> to vector<16x128xi1>
    %111 = arith.xori %107, %110 : vector<16x128xi1>
    %112 = arith.andi %111, %105 : vector<16x128xi1>
    %113 = vector.broadcast %101 : i32 to vector<16x128xi32>
    %114 = arith.addi %103, %113 : vector<16x128xi32>
    %115 = arith.select %112, %114, %103 : vector<16x128xi1>, vector<16x128xi32>
    %c0_i32_56 = arith.constant 0 : i32
    %116 = vector.broadcast %c0_i32_56 : i32 to vector<16x128xi32>
    %117 = arith.cmpi ne, %115, %116 : vector<16x128xi32>
    %c1_i32_57 = arith.constant 1 : i32
    %118 = tpu.dynamic_rotate %98 by %c1_i32_57 dim 0 : vector<16x128xf32>, i32 -> vector<16x128xf32>
    %cst_58 = arith.constant 0.000000e+00 : f32
    %119 = vector.broadcast %cst_58 : f32 to vector<16x128xf32>
    %120 = arith.select %117, %118, %119 : vector<16x128xi1>, vector<16x128xf32>
    %c7_i32_59 = arith.constant 7 : i32
    %121 = vector.broadcast %c7_i32_59 : i32 to vector<16x128xi32>
    %122 = arith.cmpi ne, %115, %121 : vector<16x128xi32>
    %c15_i32_60 = arith.constant 15 : i32
    %123 = tpu.dynamic_rotate %98 by %c15_i32_60 dim 0 : vector<16x128xf32>, i32 -> vector<16x128xf32>
    %cst_61 = arith.constant 0.000000e+00 : f32
    %124 = vector.broadcast %cst_61 : f32 to vector<16x128xf32>
    %125 = arith.select %122, %123, %124 : vector<16x128xi1>, vector<16x128xf32>
    %126 = tpu.concatenate %120, %98, %125 in 1 : vector<16x128xf32>, vector<16x128xf32>, vector<16x128xf32> -> vector<16x384xf32>
    %127 = arith.truncf %126 : vector<16x384xf32> to vector<16x384xbf16>
    %c2_62 = arith.constant 2 : index
    %c0_63 = arith.constant 0 : index
    %c0_64 = arith.constant 0 : index
    %128 = vector.load %arg2[%c2_62, %c0_63, %c0_64] : memref<5x384x128xbf16, #tpu.memory_space<vmem>>, vector<1x384x128xbf16>
    %129 = vector.shape_cast %128 : vector<1x384x128xbf16> to vector<384x128xbf16>
    %cst_65 = arith.constant dense<0.000000e+00> : vector<16x128xf32>
    %130 = tpu.matmul %127, %129, %cst_65 {dimension_numbers = #tpu.dot_dimension_numbers<[1], [0], [0], [1], [0, 0, 1, 1], [], []>} : vector<16x384xbf16>, vector<384x128xbf16>, vector<16x128xf32> -> vector<16x128xf32>
    %c3 = arith.constant 3 : index
    %c0_66 = arith.constant 0 : index
    %c0_67 = arith.constant 0 : index
    %131 = vector.load %arg3[%c3, %c0_66, %c0_67] : memref<6x1x128xf32, #tpu.memory_space<vmem>>, vector<1x1x128xf32>
    %132 = vector.shape_cast %131 : vector<1x1x128xf32> to vector<1x128xf32>
    %133 = vector.broadcast %132 : vector<1x128xf32> to vector<16x128xf32>
    %134 = arith.addf %130, %133 : vector<16x128xf32>
    %135 = arith.addf %134, %60 : vector<16x128xf32>
    %cst_68 = arith.constant 0.000000e+00 : f32
    %136 = vector.broadcast %cst_68 : f32 to vector<16x128xf32>
    %137 = arith.maximumf %135, %136 : vector<16x128xf32>
    %c0_69 = arith.constant 0 : index
    %c0_70 = arith.constant 0 : index
    %138 = vector.load %arg5[%c0_69, %c0_70] : memref<32x16xbf16, #tpu.memory_space<vmem>>, vector<32x16xbf16>
    %139 = arith.truncf %137 : vector<16x128xf32> to vector<16x128xbf16>
    %cst_71 = arith.constant dense<0.000000e+00> : vector<32x128xf32>
    %140 = tpu.matmul %138, %139, %cst_71 {dimension_numbers = #tpu.dot_dimension_numbers<[1], [0], [0], [1], [0, 0, 1, 1], [], []>} : vector<32x16xbf16>, vector<16x128xbf16>, vector<32x128xf32> -> vector<32x128xf32>
    %141 = tpu.iota {dimensions = array<i32: 0>} : vector<32x128xi32>
    %c16_i32_72 = arith.constant 16 : i32
    %c0_i32_73 = arith.constant 0 : i32
    %142 = arith.cmpi eq, %c16_i32_72, %c0_i32_73 : i32
    %c1_i32_74 = arith.constant 1 : i32
    %143 = arith.select %142, %c1_i32_74, %c16_i32_72 : i32
    %144 = vector.broadcast %143 : i32 to vector<32x128xi32>
    %145 = arith.remsi %141, %144 : vector<32x128xi32>
    %c0_i32_75 = arith.constant 0 : i32
    %146 = vector.broadcast %c0_i32_75 : i32 to vector<32x128xi32>
    %147 = arith.cmpi ne, %145, %146 : vector<32x128xi32>
    %c0_i32_76 = arith.constant 0 : i32
    %148 = vector.broadcast %c0_i32_76 : i32 to vector<32x128xi32>
    %149 = arith.cmpi slt, %145, %148 : vector<32x128xi32>
    %c0_i32_77 = arith.constant 0 : i32
    %150 = arith.cmpi slt, %143, %c0_i32_77 : i32
    %151 = vector.broadcast %150 : i1 to vector<32x128xi1>
    %152 = vector.broadcast %151 : vector<32x128xi1> to vector<32x128xi1>
    %153 = arith.xori %149, %152 : vector<32x128xi1>
    %154 = arith.andi %153, %147 : vector<32x128xi1>
    %155 = vector.broadcast %143 : i32 to vector<32x128xi32>
    %156 = arith.addi %145, %155 : vector<32x128xi32>
    %157 = arith.select %154, %156, %145 : vector<32x128xi1>, vector<32x128xi32>
    %c0_i32_78 = arith.constant 0 : i32
    %158 = vector.broadcast %c0_i32_78 : i32 to vector<32x128xi32>
    %159 = arith.cmpi ne, %157, %158 : vector<32x128xi32>
    %c1_i32_79 = arith.constant 1 : i32
    %160 = tpu.dynamic_rotate %140 by %c1_i32_79 dim 0 : vector<32x128xf32>, i32 -> vector<32x128xf32>
    %cst_80 = arith.constant 0.000000e+00 : f32
    %161 = vector.broadcast %cst_80 : f32 to vector<32x128xf32>
    %162 = arith.select %159, %160, %161 : vector<32x128xi1>, vector<32x128xf32>
    %c15_i32_81 = arith.constant 15 : i32
    %163 = vector.broadcast %c15_i32_81 : i32 to vector<32x128xi32>
    %164 = arith.cmpi ne, %157, %163 : vector<32x128xi32>
    %c31_i32_82 = arith.constant 31 : i32
    %165 = tpu.dynamic_rotate %140 by %c31_i32_82 dim 0 : vector<32x128xf32>, i32 -> vector<32x128xf32>
    %cst_83 = arith.constant 0.000000e+00 : f32
    %166 = vector.broadcast %cst_83 : f32 to vector<32x128xf32>
    %167 = arith.select %164, %165, %166 : vector<32x128xi1>, vector<32x128xf32>
    %168 = tpu.concatenate %162, %140, %167 in 1 : vector<32x128xf32>, vector<32x128xf32>, vector<32x128xf32> -> vector<32x384xf32>
    %169 = arith.truncf %168 : vector<32x384xf32> to vector<32x384xbf16>
    %c3_84 = arith.constant 3 : index
    %c0_85 = arith.constant 0 : index
    %c0_86 = arith.constant 0 : index
    %170 = vector.load %arg2[%c3_84, %c0_85, %c0_86] : memref<5x384x128xbf16, #tpu.memory_space<vmem>>, vector<1x384x128xbf16>
    %171 = vector.shape_cast %170 : vector<1x384x128xbf16> to vector<384x128xbf16>
    %cst_87 = arith.constant dense<0.000000e+00> : vector<32x128xf32>
    %172 = tpu.matmul %169, %171, %cst_87 {dimension_numbers = #tpu.dot_dimension_numbers<[1], [0], [0], [1], [0, 0, 1, 1], [], []>} : vector<32x384xbf16>, vector<384x128xbf16>, vector<32x128xf32> -> vector<32x128xf32>
    %c4 = arith.constant 4 : index
    %c0_88 = arith.constant 0 : index
    %c0_89 = arith.constant 0 : index
    %173 = vector.load %arg3[%c4, %c0_88, %c0_89] : memref<6x1x128xf32, #tpu.memory_space<vmem>>, vector<1x1x128xf32>
    %174 = vector.shape_cast %173 : vector<1x1x128xf32> to vector<1x128xf32>
    %175 = vector.broadcast %174 : vector<1x128xf32> to vector<32x128xf32>
    %176 = arith.addf %172, %175 : vector<32x128xf32>
    %cst_90 = arith.constant 0.000000e+00 : f32
    %177 = vector.broadcast %cst_90 : f32 to vector<32x128xf32>
    %178 = arith.maximumf %176, %177 : vector<32x128xf32>
    %179 = tpu.iota {dimensions = array<i32: 0>} : vector<32x128xi32>
    %c16_i32_91 = arith.constant 16 : i32
    %c0_i32_92 = arith.constant 0 : i32
    %180 = arith.cmpi eq, %c16_i32_91, %c0_i32_92 : i32
    %c1_i32_93 = arith.constant 1 : i32
    %181 = arith.select %180, %c1_i32_93, %c16_i32_91 : i32
    %182 = vector.broadcast %181 : i32 to vector<32x128xi32>
    %183 = arith.remsi %179, %182 : vector<32x128xi32>
    %c0_i32_94 = arith.constant 0 : i32
    %184 = vector.broadcast %c0_i32_94 : i32 to vector<32x128xi32>
    %185 = arith.cmpi ne, %183, %184 : vector<32x128xi32>
    %c0_i32_95 = arith.constant 0 : i32
    %186 = vector.broadcast %c0_i32_95 : i32 to vector<32x128xi32>
    %187 = arith.cmpi slt, %183, %186 : vector<32x128xi32>
    %c0_i32_96 = arith.constant 0 : i32
    %188 = arith.cmpi slt, %181, %c0_i32_96 : i32
    %189 = vector.broadcast %188 : i1 to vector<32x128xi1>
    %190 = vector.broadcast %189 : vector<32x128xi1> to vector<32x128xi1>
    %191 = arith.xori %187, %190 : vector<32x128xi1>
    %192 = arith.andi %191, %185 : vector<32x128xi1>
    %193 = vector.broadcast %181 : i32 to vector<32x128xi32>
    %194 = arith.addi %183, %193 : vector<32x128xi32>
    %195 = arith.select %192, %194, %183 : vector<32x128xi1>, vector<32x128xi32>
    %c0_i32_97 = arith.constant 0 : i32
    %196 = vector.broadcast %c0_i32_97 : i32 to vector<32x128xi32>
    %197 = arith.cmpi ne, %195, %196 : vector<32x128xi32>
    %c1_i32_98 = arith.constant 1 : i32
    %198 = tpu.dynamic_rotate %178 by %c1_i32_98 dim 0 : vector<32x128xf32>, i32 -> vector<32x128xf32>
    %cst_99 = arith.constant 0.000000e+00 : f32
    %199 = vector.broadcast %cst_99 : f32 to vector<32x128xf32>
    %200 = arith.select %197, %198, %199 : vector<32x128xi1>, vector<32x128xf32>
    %c15_i32_100 = arith.constant 15 : i32
    %201 = vector.broadcast %c15_i32_100 : i32 to vector<32x128xi32>
    %202 = arith.cmpi ne, %195, %201 : vector<32x128xi32>
    %c31_i32_101 = arith.constant 31 : i32
    %203 = tpu.dynamic_rotate %178 by %c31_i32_101 dim 0 : vector<32x128xf32>, i32 -> vector<32x128xf32>
    %cst_102 = arith.constant 0.000000e+00 : f32
    %204 = vector.broadcast %cst_102 : f32 to vector<32x128xf32>
    %205 = arith.select %202, %203, %204 : vector<32x128xi1>, vector<32x128xf32>
    %206 = tpu.concatenate %200, %178, %205 in 1 : vector<32x128xf32>, vector<32x128xf32>, vector<32x128xf32> -> vector<32x384xf32>
    %207 = arith.truncf %206 : vector<32x384xf32> to vector<32x384xbf16>
    %c4_103 = arith.constant 4 : index
    %c0_104 = arith.constant 0 : index
    %c0_105 = arith.constant 0 : index
    %208 = vector.load %arg2[%c4_103, %c0_104, %c0_105] : memref<5x384x128xbf16, #tpu.memory_space<vmem>>, vector<1x384x128xbf16>
    %209 = vector.shape_cast %208 : vector<1x384x128xbf16> to vector<384x128xbf16>
    %cst_106 = arith.constant dense<0.000000e+00> : vector<32x128xf32>
    %210 = tpu.matmul %207, %209, %cst_106 {dimension_numbers = #tpu.dot_dimension_numbers<[1], [0], [0], [1], [0, 0, 1, 1], [], []>} : vector<32x384xbf16>, vector<384x128xbf16>, vector<32x128xf32> -> vector<32x128xf32>
    %c5 = arith.constant 5 : index
    %c0_107 = arith.constant 0 : index
    %c0_108 = arith.constant 0 : index
    %211 = vector.load %arg3[%c5, %c0_107, %c0_108] : memref<6x1x128xf32, #tpu.memory_space<vmem>>, vector<1x1x128xf32>
    %212 = vector.shape_cast %211 : vector<1x1x128xf32> to vector<1x128xf32>
    %213 = vector.broadcast %212 : vector<1x128xf32> to vector<32x128xf32>
    %214 = arith.addf %210, %213 : vector<32x128xf32>
    %215 = math.tanh %214 : vector<32x128xf32>
    %c0_109 = arith.constant 0 : index
    %c0_110 = arith.constant 0 : index
    %216 = vector.load %arg6[%c0_109, %c0_110] : memref<16x128xf32, #tpu.memory_space<vmem>>, vector<16x128xf32>
    tpu.vector_store %arg6[%c0_109, %c0_110], %137 {strides = array<i32>} : memref<16x128xf32, #tpu.memory_space<vmem>>, vector<16x128xf32>,
    %c0_111 = arith.constant 0 : index
    %c0_112 = arith.constant 0 : index
    %217 = vector.load %arg7[%c0_111, %c0_112] : memref<32x128xf32, #tpu.memory_space<vmem>>, vector<32x128xf32>
    tpu.vector_store %arg7[%c0_111, %c0_112], %215 {strides = array<i32>} : memref<32x128xf32, #tpu.memory_space<vmem>>, vector<32x128xf32>,
    return
  }
}

</mosaic_0001>

<bundles_post_ra>
// kernel: gan_forward.1
= control target key start
LH: loop header
LB: loop body
LE: loop exit
PB: predicated region body
PF: predicated region fallthrough
CT: control target
= control target key end

     0   :  { %13 = vsyncpa [#allocation3], 0  ;;  %s2619_s27 = smov [#allocation2]   ;;  %s2620_s29 = smov 64   ;;  %s2972_s0 = inlined_call_operand.vmem [shape: f32[32,48], index: 0, kind: input, shape index: {}]   ;;  %s2973_s1 = inlined_call_operand.vmem [shape: bf16[144,128], index: 1, kind: input, shape index: {}]   ;;  %s2974_s2 = inlined_call_operand.hbm [shape: bf16[5,384,128], index: 2, kind: input, shape index: {}]   ;;  %s2975_s3 = inlined_call_operand.vmem [shape: f32[6,1,128], index: 3, kind: input, shape index: {}]   ;;  %s2976_s4 = inlined_call_operand.vmem [shape: bf16[3,16,32], index: 4, kind: input, shape index: {}]   ;;  %s2977_s5 = inlined_call_operand.vmem [shape: bf16[32,16], index: 5, kind: input, shape index: {}]   ;;  %s2978_s6 = inlined_call_operand.vmem [shape: f32[16,128], index: 6, kind: output, shape index: {0}]   ;;  %s2979_s7 = inlined_call_operand.vmem [shape: f32[32,128], index: 7, kind: output, shape index: {1}]  }
   0x1   :  { %s22_s26 = sshll.u32 %s2974_s2, 4  ;;  %s24_s28 = sshll.u32 %s2619_s27, 4  ;;  %s23_s26 = int_to_ptr.hbm [resolvable:$true] %s22_s26  ;;  %s25_s28 = int_to_ptr.vmem [resolvable:$true] %s24_s28 }
   0x2   :  { %s2621_s30 = smov 4  }
   0x3   :  { %30 = dma.hbm_to_vmem [thread:$0]  %s23_s26, 15360, %s25_s28, [#allocation3], %s2620_s29, %s2620_s29, %s2621_s30  }
   0x4   :  { %2617 = dma.done.wait [#allocation3], 15360  }
   0x5   :  { %2618 = vsyncadd [#allocation3], 4294951936  ;;  %v46_v0 = vlaneseq  ;;  %v42_v6 = vld [vmem:[%s2972_s0] sm:$0xff]  ;;  %v43_v7 = vld [vmem:[%s2972_s0 + $0x8] sm:$0xff]  ;;  %s2622_s17 = smov 48   ;;  %s2623_s21 = smov 96  }
   0x6   :  { %v2684_v8 = vld [vmem:[%s2972_s0 + $0x10] sm:$0xff]  ;;  %v121_v9 = vrot.slane %v43_v7, 1  ;;  %v2559_v10 = vpack.i.bf16 %v43_v7, %v42_v6  ;;  %v45_v11 = vld [vmem:[%s2972_s0 + $0x18] sm:$0xff]  ;;  %v120_v13 = vrot.slane %v42_v6, 1  ;;  %v2416_v27 = vld [vmem:[%s2973_s1 + $0x28] sm:$0xff]  ;;  %v103_v31 = vrot.slane %v42_v6, 7 }
   0x7   :  { %v2668_v1 = vshrl.u32 %v46_v0, 7  ;;  %v2418_v12 = vld [vmem:[%s2973_s1 + $0x38] sm:$0xff]  ;;  %v122_v15 = vrot.slane %v2684_v8, 1  ;;  %v123_v16 = vrot.slane %v45_v11, 1  ;;  %v2569_v17 = vpack.i.bf16 %v45_v11, %v2684_v8  ;;  %v2417_v19 = vld [vmem:[%s2973_s1 + $0x30] sm:$0xff]  ;;  %v2415_v29 = vld [vmem:[%s2973_s1 + $0x20] sm:$0xff] }
   0x8   :  { %2560 = vrot.lane.b32.xlu0 %v2559_v10, %s2622_s17  ;;  %262 = vmatpush.bf16.msra.mxu0 %v2418_v12  ;;  %v2414_v30 = vld [vmem:[%s2973_s1 + $0x18] sm:$0xff]  ;;  %v106_v32 = vrot.slane %v45_v11, 7  ;;  %v104_v33 = vrot.slane %v43_v7, 7  ;;  %v2413_v34 = vld [vmem:[%s2973_s1 + $0x10] sm:$0xff]  ;;  %v2412_v37 = vld [vmem:[%s2973_s1 + $0x8] sm:$0xff]  ;;  %v105_v44 = vrot.slane %v2684_v8, 7 }
   0x9   :  { %v2671_v2 = vadd.s32 8, %v2668_v1  ;;  %v50_v3 = vadd.s32 24, %v2668_v1  ;;  %vm124_vm0 = vcmp.lt.s32.totalorder %v2668_v1, 7  ;;  %2570 = vrot.lane.b32.xlu1 %v2569_v17, %s2622_s17  ;;  %vm107_vm3 = vcmp.lt.s32.totalorder %v2668_v1, 1  ;;  %v2419_v38 = vld [vmem:[%s2973_s1 + $0x40] sm:$0xff] }
   0xa   :  { %v126_v20 = vsel %vm124_vm0, %v121_v9, %v122_v15  ;;  %v127_v21 = vsel %vm124_vm0, %v120_v13, %v121_v9  ;;  %v128_v23 = vsel %vm124_vm0, %v123_v16, %v120_v13  ;;  %v125_v24 = vsel %vm124_vm0, %v122_v15, %v123_v16  ;;  %v2411_v39 = vld [vmem:[%s2973_s1] sm:$0xff]  ;;  %288 = vmatpush.bf16.msra.mxu1 %v2419_v38 }
   0xb   :  { %v62_v4 = vand.u32 15, %v2671_v2  ;;  %v76_v5 = vand.u32 15, %v50_v3  ;;  %v111_v35 = vsel %vm107_vm3, %v106_v32, %v103_v31  ;;  %v110_v36 = vsel %vm107_vm3, %v103_v31, %v104_v33  ;;  %v2533_v47 = vld [vmem:[#allocation2 + $0x360] sm:$0xff] }
   0xc   :  { %263 = vmatpush.bf16.msra.mxu0 %v2417_v19  ;;  %v49_v40 = vadd.s32 16, %v2668_v1  ;;  %v55_v42 = vand.u32 15, %v2668_v1  ;;  %v109_v48 = vsel %vm107_vm3, %v104_v33, %v105_v44  ;;  %vm165_vm6 = vcmask 392192   ;;  %v2584_v14 = vld [vmem:[%s2975_s3 + $0x5] ss:$0 sm:$0xff] }
   0xd   :  { %vm2693_vm1 = vcmp.ne.s32.totalorder %v62_v4, 15  ;;  %vm2699_vm2 = vcmp.ne.s32.totalorder %v76_v5, 15  ;;  %v108_v54 = vsel %vm107_vm3, %v105_v44, %v106_v32  ;;  %vm170_vm7 = vcmask 785408   ;;  %v2437_v44 = vld [vmem:[#allocation2 + $0x70] sm:$0xff] }
   0xe   :  { %v130_v22 = vsel %vm2693_vm1, %v126_v20, 0.0  ;;  %v132_v25 = vsel %vm2699_vm2, %v128_v23, 0.0  ;;  %v69_v43 = vand.u32 15, %v49_v40  ;;  %vm2747_vm4 = vcmp.ne.s32.totalorder %v55_v42, 0  ;;  %v2579_v20 = vld [vmem:[%s2975_s3] ss:$0 sm:$0xff] }
   0xf   :  { %v2564_v26 = vpack.i.bf16 %v130_v22, %v127_v21  ;;  %v2574_v28 = vpack.i.bf16 %v132_v25, %v125_v24  ;;  %v112_v53 = vsel %vm2747_vm4, %v111_v35, 0.0  ;;  %vm255_vm8 = vcmask 130048   ;;  %v2430_v24 = vld [vmem:[#allocation2 + $0x38] sm:$0xff]  ;;  %v2428_v35 = vld [vmem:[#allocation2 + $0x28] sm:$0xff]  ;;  %v2420_v42 = vld [vmem:[%s2976_s4] sm:$0xff] }
  0x10   :  { %264 = vmatpush.bf16.msra.mxu0 %v2416_v27  ;;  %vm2751_vm5 = vcmp.ne.s32.totalorder %v69_v43, 0  ;;  %602 = vmatpush.bf16.msrb.mxu1 %v2430_v24  ;;  %v2421_v43 = vld [vmem:[%s2976_s4 + $0x8] sm:$0xff]  ;;  %vm313_vm9 = vcmask 261120  }
  0x11   :  { %2565 = vrot.lane.b32.xlu0 %v2564_v26, %s2623_s21  ;;  %2575 = vrot.lane.b32.xlu1 %v2574_v28, %s2623_s21  ;;  %v114_v55 = vsel %vm2751_vm5, %v109_v48, 0.0  ;;  %v2435_v48 = vld [vmem:[#allocation2 + $0x60] sm:$0xff] }
  0x14   :  { %265 = vmatpush.bf16.msra.mxu0 %v2415_v29  ;;  %v2429_v29 = vld [vmem:[#allocation2 + $0x30] sm:$0xff] }
  0x15   :  { %603 = vmatpush.bf16.msrb.mxu1 %v2429_v29  ;;  %v2470_v29 = vld [vmem:[#allocation2 + $0x178] sm:$0xff] }
  0x18   :  { %266 = vmatpush.bf16.msra.mxu0 %v2414_v30 }
  0x19   :  { %604 = vmatpush.bf16.msrb.mxu1 %v2428_v35  ;;  %v2468_v35 = vld [vmem:[#allocation2 + $0x168] sm:$0xff] }
  0x1c   :  { %267 = vmatpush.bf16.msra.mxu0 %v2413_v34 }
  0x20   :  { %268 = vmatpush.bf16.msra.mxu0 %v2412_v37 }
  0x24   :  { %269 = vmatpush.bf16.msra.mxu0 %v2411_v39  ;;  %v2438_v39 = vld [vmem:[#allocation2 + $0x78] sm:$0xff] }
  0x7a   :  { %v2561_v41 = vpop.permute.xlu0 %2560 }
  0x7b   :  { %v2571_v45 = vpop.permute.xlu1 %2570  ;;  %v2563_v49 = vunpack.i.h.bf16 %v2561_v41  ;;  %v2562_v50 = vunpack.i.l.bf16 %v2561_v41  ;;  %v2427_v41 = vld [vmem:[#allocation2 + $0x20] sm:$0xff] }
  0x7c   :  { %v2573_v51 = vunpack.i.h.bf16 %v2571_v45  ;;  %v2572_v52 = vunpack.i.l.bf16 %v2571_v45  ;;  %605 = vmatpush.bf16.msrb.mxu1 %v2427_v41  ;;  %v2436_v45 = vld [vmem:[#allocation2 + $0x68] sm:$0xff]  ;;  %v2466_v41 = vld [vmem:[#allocation2 + $0x158] sm:$0xff] }
  0x7d   :  { %v166_v59 = vsel %vm165_vm6, %v112_v53, %v2562_v50  ;;  %v167_v60 = vsel %vm165_vm6, %v110_v36, %v2563_v49  ;;  %v2422_v49 = vld [vmem:[%s2976_s4 + $0x10] sm:$0xff]  ;;  %v2426_v50 = vld [vmem:[#allocation2 + $0x18] sm:$0xff] }
  0x7e   :  { %v168_v62 = vsel %vm165_vm6, %v114_v55, %v2572_v52  ;;  %v169_v63 = vsel %vm165_vm6, %v108_v54, %v2573_v51  ;;  %v2434_v51 = vld [vmem:[#allocation2 + $0x58] sm:$0xff]  ;;  %v2425_v53 = vld [vmem:[#allocation2 + $0x10] sm:$0xff]  ;;  %vm2624_vm6 = vmmov 1  }
  0x7f   :  { %v2446_v52 = vld [vmem:[#allocation2 + $0xb8] sm:$0xff]  ;;  %v2433_v54 = vld [vmem:[#allocation2 + $0x50] sm:$0xff] }
  0x80   :  { %606 = vmatpush.bf16.msrb.mxu1 %v2426_v50  ;;  %v2445_v55 = vld [vmem:[#allocation2 + $0xb0] sm:$0xff]  ;;  %v2455_v50 = vld [vmem:[#allocation2 + $0x100] sm:$0xff] }
  0x83   :  { %v2566_v56 = vpop.permute.xlu0 %2565  ;;  %v2576_v61 = vpop.permute.xlu1 %2575 }
  0x84   :  { %v2568_v57 = vunpack.i.h.bf16 %v2566_v56  ;;  %v2567_v58 = vunpack.i.l.bf16 %v2566_v56  ;;  %v2578_v5 = vunpack.i.h.bf16 %v2576_v61  ;;  %v2577_v7 = vunpack.i.l.bf16 %v2576_v61  ;;  %607 = vmatpush.bf16.msrb.mxu1 %v2425_v53  ;;  %v2424_v56 = vld [vmem:[#allocation2 + $0x8] sm:$0xff]  ;;  %v2443_v61 = vld [vmem:[#allocation2 + $0xa0] sm:$0xff]  ;;  %v2486_v53 = vld [vmem:[#allocation2 + $0x1f8] sm:$0xff] }
  0x86   :  { %v176_v0 = vpack.c.bf16 %v2568_v57, %v2567_v58  ;;  %v171_v3 = vsel %vm170_vm7, %v166_v59, %v2567_v58  ;;  %v172_v4 = vsel %vm170_vm7, %v167_v60, %v2568_v57  ;;  %v174_v8 = vsel %vm170_vm7, %v169_v63, %v2578_v5  ;;  %v2432_v57 = vld [vmem:[#allocation2 + $0x48] sm:$0xff]  ;;  %v2423_v59 = vld [vmem:[#allocation2] sm:$0xff]  ;;  %v2441_v63 = vld [vmem:[#allocation2 + $0x90] sm:$0xff] }
  0x87   :  { %v175_v6 = vpack.c.bf16 %v172_v4, %v171_v3  ;;  %v173_v9 = vsel %vm170_vm7, %v168_v62, %v2577_v7  ;;  %v178_v11 = vpack.c.bf16 %v2578_v5, %v2577_v7  ;;  %v2444_v58 = vld [vmem:[#allocation2 + $0xa8] sm:$0xff]  ;;  %v2431_v60 = vld [vmem:[#allocation2 + $0x40] sm:$0xff]  ;;  %v2442_v62 = vld [vmem:[#allocation2 + $0x98] sm:$0xff] }
  0x88   :  { %1859 = vmatmul.msk.bf16.vlgmr.msra.gmra.mxu1 %vm255_vm8, %v176_v0  ;;  %v177_v10 = vpack.c.bf16 %v174_v8, %v173_v9  ;;  %v2440_v0 = vld [vmem:[#allocation2 + $0x88] sm:$0xff]  ;;  %v2439_v3 = vld [vmem:[#allocation2 + $0x80] sm:$0xff]  ;;  %vm2885_vm7 = vmpackc.low %vm2693_vm1, %vm2624_vm6 }
  0x89   :  { %270 = vmatmul.bf16.vlgmr.msra.gmra.mxu0 %v175_v6  ;;  %608 = vmatpush.bf16.msrb.mxu1 %v2424_v56  ;;  %v2485_v56 = vld [vmem:[#allocation2 + $0x1f0] sm:$0xff]  ;;  %vm2898_vm1 = vmpackc.low %vm2624_vm6, %vm2747_vm4 }
  0x8a   :  { %vm2924_vm4 = vmpackc.low %vm2624_vm6, %vm2751_vm5 }
  0x8d   :  { %609 = vmatpush.bf16.msrb.mxu1 %v2423_v59  ;;  %v2580_v59 = vld [vmem:[%s2975_s3 + $0x1] ss:$0 sm:$0xff] }
  0x98   :  { %1860 = vmatmul.msk.bf16.gmra.mxu1 %vm255_vm8, %v178_v11 }
  0x99   :  { %275 = vmatmul.bf16.gmra.mxu0 %v177_v10 }
 0x105   :  { %v290_v12 = vpop.f32.mrf.mxu1 }
 0x106   :  { %v271_v13 = vpop.f32.mrf.mxu0 }
 0x107   :  { %v272_v25 = vadd.f32 %v2579_v20, %v271_v13 }
 0x109   :  { %v291_v32 = vadd.f32 %v290_v12, %v272_v25 }
 0x10b   :  { %v300_v38 = vmax.f32 %v291_v32, 0.0  ;;  %v2469_v32 = vld [vmem:[#allocation2 + $0x170] sm:$0xff] }
 0x10d   :  { %v292_v15 = vpop.f32.mrf.mxu1 }
 0x10e   :  { %v273_v16 = vpop.f32.mrf.mxu0 }
 0x10f   :  { %v274_v22 = vadd.f32 %v2579_v20, %v273_v16 }
 0x111   :  { %v293_v30 = vadd.f32 %v292_v15, %v274_v22 }
 0x113   :  { %v301_v36 = vmax.f32 %v293_v30, 0.0  ;;  %v2461_v30 = vld [vmem:[#allocation2 + $0x130] sm:$0xff] }
 0x115   :  { %v295_v17 = vpop.f32.mrf.mxu1  ;;  %v304_v40 = vpack.c.bf16 %v301_v36, %v300_v38  ;;  %v2459_v36 = vld [vmem:[#allocation2 + $0x120] sm:$0xff] }
 0x116   :  { %v276_v19 = vpop.f32.mrf.mxu0  ;;  %v2467_v38 = vld [vmem:[#allocation2 + $0x160] sm:$0xff] }
 0x117   :  { %v277_v21 = vadd.f32 %v2579_v20, %v276_v19 }
 0x119   :  { %v296_v26 = vadd.f32 %v295_v17, %v277_v21 }
 0x11b   :  { %v302_v33 = vmax.f32 %v296_v26, 0.0 }
 0x11d   :  { %v297_v28 = vpop.f32.mrf.mxu1 }
 0x11e   :  { %v278_v23 = vpop.f32.mrf.mxu0 }
 0x11f   :  { %v279_v27 = vadd.f32 %v2579_v20, %v278_v23 }
 0x121   :  { %v298_v31 = vadd.f32 %v297_v28, %v279_v27  ;;  %v2462_v27 = vld [vmem:[#allocation2 + $0x138] sm:$0xff] }
 0x122   :  { %901 = vmatpush.bf16.msra.mxu1 %v2462_v27  ;;  %v2454_v28 = vld [vmem:[#allocation2 + $0xf8] sm:$0xff] }
 0x123   :  { %v303_v34 = vmax.f32 %v298_v31, 0.0  ;;  %887 = vmatpush.bf16.msrb.mxu0 %v2454_v28  ;;  %v2453_v31 = vld [vmem:[#allocation2 + $0xf0] sm:$0xff] }
 0x124   :  { %v2477_v28 = vld [vmem:[#allocation2 + $0x1b0] sm:$0xff] }
 0x125   :  { %v305_v37 = vpack.c.bf16 %v303_v34, %v302_v33  ;;  %v2460_v33 = vld [vmem:[#allocation2 + $0x128] sm:$0xff] }
 0x126   :  { %902 = vmatpush.bf16.msra.mxu1 %v2461_v30  ;;  %v2452_v34 = vld [vmem:[#allocation2 + $0xe8] sm:$0xff] }
 0x127   :  { %323 = vmatpush.bf16.msra.mxu2 %v305_v37  ;;  %350 = vmatpush.bf16.msra.mxu3 %v305_v37  ;;  %v2484_v30 = vld [vmem:[#allocation2 + $0x1e8] sm:$0xff] }
 0x128   :  { %888 = vmatpush.bf16.msrb.mxu0 %v2453_v31  ;;  %v2476_v31 = vld [vmem:[#allocation2 + $0x1a8] sm:$0xff] }
 0x12a   :  { %903 = vmatpush.bf16.msra.mxu1 %v2460_v33  ;;  %v2483_v33 = vld [vmem:[#allocation2 + $0x1e0] sm:$0xff] }
 0x12b   :  { %324 = vmatpush.bf16.msra.mxu2 %v304_v40  ;;  %351 = vmatpush.bf16.msra.mxu3 %v304_v40 }
 0x12c   :  { %889 = vmatpush.bf16.msrb.mxu0 %v2452_v34  ;;  %v2475_v34 = vld [vmem:[#allocation2 + $0x1a0] sm:$0xff] }
 0x12e   :  { %1865 = vmatmul.msk.bf16.vlgmr.msra.gmra.mxu2 %vm313_vm9, %v2420_v42  ;;  %1872 = vmatmul.msk.bf16.vlgmr.msra.gmra.mxu3 %vm313_vm9, %v2421_v43  ;;  %v2457_v42 = vld [vmem:[#allocation2 + $0x110] sm:$0xff] }
 0x12f   :  { %377 = vmatpush.bf16.msrb.mxu2 %v305_v37  ;;  %616 = vmatpush.bf16.msrb.mxu3 %v2438_v39  ;;  %v2451_v37 = vld [vmem:[#allocation2 + $0xe0] sm:$0xff]  ;;  %v2458_v39 = vld [vmem:[#allocation2 + $0x118] sm:$0xff]  ;;  %v2449_v43 = vld [vmem:[#allocation2 + $0xd0] sm:$0xff] }
 0x130   :  { %904 = vmatpush.bf16.msra.mxu1 %v2459_v36  ;;  %890 = vmatpush.bf16.msrb.mxu0 %v2451_v37  ;;  %v2482_v36 = vld [vmem:[#allocation2 + $0x1d8] sm:$0xff] }
 0x131   :  { %v2474_v37 = vld [vmem:[#allocation2 + $0x198] sm:$0xff] }
 0x133   :  { %378 = vmatpush.bf16.msrb.mxu2 %v304_v40  ;;  %617 = vmatpush.bf16.msrb.mxu3 %v2437_v44  ;;  %v2450_v40 = vld [vmem:[#allocation2 + $0xd8] sm:$0xff]  ;;  %v2465_v44 = vld [vmem:[#allocation2 + $0x150] sm:$0xff] }
 0x134   :  { %905 = vmatpush.bf16.msra.mxu1 %v2458_v39  ;;  %891 = vmatpush.bf16.msrb.mxu0 %v2450_v40  ;;  %v2481_v39 = vld [vmem:[#allocation2 + $0x1d0] sm:$0xff] }
 0x135   :  { %v2473_v40 = vld [vmem:[#allocation2 + $0x190] sm:$0xff] }
 0x137   :  { %618 = vmatpush.bf16.msrb.mxu3 %v2436_v45  ;;  %630 = vmatpush.bf16.msra.mxu2 %v2446_v52  ;;  %v2456_v45 = vld [vmem:[#allocation2 + $0x108] sm:$0xff]  ;;  %v2463_v52 = vld [vmem:[#allocation2 + $0x140] sm:$0xff] }
 0x138   :  { %906 = vmatpush.bf16.msra.mxu1 %v2457_v42  ;;  %892 = vmatpush.bf16.msrb.mxu0 %v2449_v43  ;;  %v2480_v42 = vld [vmem:[#allocation2 + $0x1c8] sm:$0xff] }
 0x139   :  { %v2472_v43 = vld [vmem:[#allocation2 + $0x188] sm:$0xff] }
 0x13b   :  { %619 = vmatpush.bf16.msrb.mxu3 %v2435_v48  ;;  %631 = vmatpush.bf16.msra.mxu2 %v2445_v55  ;;  %v2448_v48 = vld [vmem:[#allocation2 + $0xc8] sm:$0xff]  ;;  %v2494_v55 = vld [vmem:[#allocation2 + $0x238] sm:$0xff] }
 0x13c   :  { %907 = vmatpush.bf16.msra.mxu1 %v2456_v45  ;;  %893 = vmatpush.bf16.msrb.mxu0 %v2448_v48  ;;  %v2479_v45 = vld [vmem:[#allocation2 + $0x1c0] sm:$0xff] }
 0x13d   :  { %v2471_v48 = vld [vmem:[#allocation2 + $0x180] sm:$0xff] }
 0x13e   :  { %1879 = vmatmul.msk.bf16.vlgmr.msrb.gmra.mxu2 %vm313_vm9, %v2422_v49  ;;  %v2464_v49 = vld [vmem:[#allocation2 + $0x148] sm:$0xff] }
 0x13f   :  { %620 = vmatpush.bf16.msrb.mxu3 %v2434_v51  ;;  %632 = vmatpush.bf16.msra.mxu2 %v2444_v58  ;;  %v2447_v51 = vld [vmem:[#allocation2 + $0xc0] sm:$0xff] }
 0x140   :  { %908 = vmatpush.bf16.msra.mxu1 %v2455_v50  ;;  %894 = vmatpush.bf16.msrb.mxu0 %v2447_v51  ;;  %v2581_v50 = vld [vmem:[%s2975_s3 + $0x2] ss:$0 sm:$0xff] }
 0x143   :  { %621 = vmatpush.bf16.msrb.mxu3 %v2433_v54  ;;  %633 = vmatpush.bf16.msra.mxu2 %v2443_v61  ;;  %v2478_v54 = vld [vmem:[#allocation2 + $0x1b8] sm:$0xff] }
 0x144   :  { %1158 = vmatpush.bf16.msra.mxu0 %v2486_v53 }
 0x147   :  { %622 = vmatpush.bf16.msrb.mxu3 %v2432_v57  ;;  %634 = vmatpush.bf16.msra.mxu2 %v2442_v62 }
 0x148   :  { %1159 = vmatpush.bf16.msra.mxu0 %v2485_v56 }
 0x14b   :  { %623 = vmatpush.bf16.msrb.mxu3 %v2431_v60  ;;  %635 = vmatpush.bf16.msra.mxu2 %v2441_v63 }
 0x14c   :  { %1160 = vmatpush.bf16.msra.mxu0 %v2484_v30  ;;  %v2520_v30 = vld [vmem:[#allocation2 + $0x2f8] sm:$0xff] }
 0x14f   :  { %636 = vmatpush.bf16.msra.mxu2 %v2440_v0  ;;  %915 = vmatpush.bf16.msra.mxu3 %v2470_v29  ;;  %v2493_v29 = vld [vmem:[#allocation2 + $0x230] sm:$0xff] }
 0x150   :  { %1161 = vmatpush.bf16.msra.mxu0 %v2483_v33 }
 0x153   :  { %637 = vmatpush.bf16.msra.mxu2 %v2439_v3  ;;  %916 = vmatpush.bf16.msra.mxu3 %v2469_v32  ;;  %v2492_v32 = vld [vmem:[#allocation2 + $0x228] sm:$0xff] }
 0x154   :  { %1162 = vmatpush.bf16.msra.mxu0 %v2482_v36 }
 0x157   :  { %917 = vmatpush.bf16.msra.mxu3 %v2468_v35  ;;  %1144 = vmatpush.bf16.msrb.mxu2 %v2478_v54  ;;  %v2491_v35 = vld [vmem:[#allocation2 + $0x220] sm:$0xff] }
 0x158   :  { %1163 = vmatpush.bf16.msra.mxu0 %v2481_v39 }
 0x15b   :  { %918 = vmatpush.bf16.msra.mxu3 %v2467_v38  ;;  %1145 = vmatpush.bf16.msrb.mxu2 %v2477_v28  ;;  %v2490_v38 = vld [vmem:[#allocation2 + $0x218] sm:$0xff] }
 0x15c   :  { %1164 = vmatpush.bf16.msra.mxu0 %v2480_v42  ;;  %v2512_v28 = vld [vmem:[#allocation2 + $0x2b8] sm:$0xff]  ;;  %v2495_v42 = vld [vmem:[%s2977_s5] sm:$0xff] }
 0x15f   :  { %919 = vmatpush.bf16.msra.mxu3 %v2466_v41  ;;  %1146 = vmatpush.bf16.msrb.mxu2 %v2476_v31  ;;  %v2489_v41 = vld [vmem:[#allocation2 + $0x210] sm:$0xff] }
 0x160   :  { %1165 = vmatpush.bf16.msra.mxu0 %v2479_v45  ;;  %v2511_v31 = vld [vmem:[#allocation2 + $0x2b0] sm:$0xff] }
 0x161   :  { %v2503_v45 = vld [vmem:[#allocation2 + $0x270] sm:$0xff] }
 0x163   :  { %920 = vmatpush.bf16.msra.mxu3 %v2465_v44  ;;  %1147 = vmatpush.bf16.msrb.mxu2 %v2475_v34  ;;  %v2488_v44 = vld [vmem:[#allocation2 + $0x208] sm:$0xff]  ;;  %v2519_v34 = vld [vmem:[#allocation2 + $0x2f0] sm:$0xff] }
 0x167   :  { %921 = vmatpush.bf16.msra.mxu3 %v2464_v49  ;;  %1148 = vmatpush.bf16.msrb.mxu2 %v2474_v37  ;;  %v2487_v49 = vld [vmem:[#allocation2 + $0x200] sm:$0xff] }
 0x16b   :  { %922 = vmatpush.bf16.msra.mxu3 %v2463_v52  ;;  %1149 = vmatpush.bf16.msrb.mxu2 %v2473_v40  ;;  %v2509_v40 = vld [vmem:[#allocation2 + $0x2a0] sm:$0xff] }
 0x16f   :  { %1150 = vmatpush.bf16.msrb.mxu2 %v2472_v43  ;;  %v2508_v43 = vld [vmem:[#allocation2 + $0x298] sm:$0xff] }
 0x173   :  { %1151 = vmatpush.bf16.msrb.mxu2 %v2471_v48  ;;  %v2517_v48 = vld [vmem:[#allocation2 + $0x2e0] sm:$0xff] }
 0x1b1   :  { %v326_v4 = vpop.f32.mrf.mxu2  ;;  %v353_v5 = vpop.f32.mrf.mxu3 }
 0x1b2   :  { %v358_v6 = vpack.c.bf16 %v353_v5, %v353_v5  ;;  %v331_v7 = vpack.c.bf16 %v326_v4, %v326_v4 }
 0x1b4   :  { %v395_v10 = vunpack.c.l.b16 %v358_v6  ;;  %v389_v13 = vunpack.c.l.b16 %v331_v7  ;;  %v650_v6 = vand.u32 7, %v2668_v1  ;;  %v657_v7 = vand.u32 7, %v2671_v2 }
 0x1b6   :  { %vm2790_vm10 = vcmp.ne.s32.totalorder %v650_v6, 0  ;;  %vm2794_vm11 = vcmp.ne.s32.totalorder %v657_v7, 0  ;;  %vm2799_vm12 = vcmp.ne.s32.totalorder %v650_v6, 7  ;;  %vm2803_vm13 = vcmp.ne.s32.totalorder %v657_v7, 7 }
 0x1b7   :  { %vm2074_vm14 = vmpackc.low %vm2794_vm11, %vm2790_vm10 }
 0x1b8   :  { %vm2077_vm15 = vmpackc.low %vm2803_vm13, %vm2799_vm12 }
 0x1b9   :  { %v328_v8 = vpop.f32.mrf.mxu2  ;;  %v355_v9 = vpop.f32.mrf.mxu3 }
 0x1ba   :  { %v332_v11 = vpack.c.bf16 %v328_v8, %v328_v8  ;;  %v359_v12 = vpack.c.bf16 %v355_v9, %v355_v9 }
 0x1bc   :  { %v390_v15 = vunpack.c.l.b16 %v332_v11  ;;  %v396_v16 = vunpack.c.l.b16 %v359_v12 }
 0x1be   :  { %v391_v17 = vpack.c.b16 %v390_v15, %v389_v13  ;;  %v397_v19 = vpack.c.b16 %v396_v16, %v395_v10 }
 0x1c0   :  { %610 = vmatmul.bf16.vlgmr.msrb.gmra.mxu1 %v391_v17  ;;  %624 = vmatmul.bf16.vlgmr.msrb.gmra.mxu3 %v397_v19 }
 0x1c1   :  { %v380_v20 = vpop.f32.mrf.mxu2  ;;  %1172 = vmatpush.bf16.msrb.mxu1 %v2494_v55  ;;  %1477 = vmatpush.bf16.msrb.mxu3 %v2512_v28 }
 0x1c2   :  { %v385_v21 = vpack.c.bf16 %v380_v20, %v380_v20 }
 0x1c4   :  { %v401_v24 = vunpack.c.l.b16 %v385_v21 }
 0x1c5   :  { %1173 = vmatpush.bf16.msrb.mxu1 %v2493_v29  ;;  %1478 = vmatpush.bf16.msrb.mxu3 %v2511_v31  ;;  %v2534_v31 = vld [vmem:[#allocation2 + $0x368] sm:$0xff] }
 0x1c9   :  { %v382_v22 = vpop.f32.mrf.mxu2  ;;  %1174 = vmatpush.bf16.msrb.mxu1 %v2492_v32  ;;  %v2504_v32 = vld [vmem:[#allocation2 + $0x278] sm:$0xff] }
 0x1ca   :  { %v386_v23 = vpack.c.bf16 %v382_v22, %v382_v22 }
 0x1cc   :  { %v402_v25 = vunpack.c.l.b16 %v386_v23 }
 0x1cd   :  { %1175 = vmatpush.bf16.msrb.mxu1 %v2491_v35 }
 0x1ce   :  { %v403_v26 = vpack.c.b16 %v402_v25, %v401_v24 }
 0x1d0   :  { %638 = vmatmul.bf16.vlgmr.msra.gmra.mxu2 %v403_v26 }
 0x1d1   :  { %1176 = vmatpush.bf16.msrb.mxu1 %v2490_v38  ;;  %1458 = vmatpush.bf16.msra.mxu2 %v2504_v32  ;;  %v2518_v38 = vld [vmem:[#allocation2 + $0x2e8] sm:$0xff]  ;;  %v2544_v32 = vld [vmem:[#allocation2 + $0x3b8] sm:$0xff] }
 0x1d5   :  { %1177 = vmatpush.bf16.msrb.mxu1 %v2489_v41  ;;  %1459 = vmatpush.bf16.msra.mxu2 %v2503_v45  ;;  %v2538_v45 = vld [vmem:[#allocation2 + $0x388] sm:$0xff] }
 0x1d9   :  { %1178 = vmatpush.bf16.msrb.mxu1 %v2488_v44  ;;  %v2507_v44 = vld [vmem:[#allocation2 + $0x290] sm:$0xff] }
 0x1dd   :  { %1179 = vmatpush.bf16.msrb.mxu1 %v2487_v49  ;;  %v2506_v49 = vld [vmem:[#allocation2 + $0x288] sm:$0xff] }
 0x23d   :  { %v611_v57 = vpop.f32.mrf.mxu1 }
 0x23e   :  { %v612_v60 = vadd.f32 %v2580_v59, %v611_v57 }
 0x243   :  { %v625_v58 = vpop.f32.mrf.mxu3 }
 0x244   :  { %v626_v62 = vadd.f32 %v625_v58, %v612_v60 }
 0x245   :  { %v613_v63 = vpop.f32.mrf.mxu1 }
 0x246   :  { %v614_v4 = vadd.f32 %v2580_v59, %v613_v63 }
 0x24b   :  { %v627_v0 = vpop.f32.mrf.mxu3 }
 0x24c   :  { %v628_v5 = vadd.f32 %v627_v0, %v614_v4 }
 0x253   :  { %v639_v61 = vpop.f32.mrf.mxu2 }
 0x254   :  { %v640_v3 = vadd.f32 %v639_v61, %v626_v62 }
 0x256   :  { %v2786_v8 = vmax.f32 %v640_v3, 0.0 }
 0x258   :  { %v672_v15 = vrot.slane %v2786_v8, 7  ;;  %v680_v17 = vrot.slane %v2786_v8, 1 }
 0x25b   :  { %v641_v9 = vpop.f32.mrf.mxu2 }
 0x25c   :  { %v642_v10 = vadd.f32 %v641_v9, %v628_v5 }
 0x25e   :  { %v2788_v11 = vmax.f32 %v642_v10, 0.0 }
 0x260   :  { %v673_v19 = vrot.slane %v2788_v11, 7  ;;  %v681_v20 = vrot.slane %v2788_v11, 1  ;;  %v687_v21 = vpack.c.bf16 %v2788_v11, %v2786_v8 }
 0x262   :  { %909 = vmatmul.bf16.vlgmr.msra.gmra.mxu1 %v687_v21  ;;  %v674_v22 = vsel %vm107_vm3, %v672_v15, %v673_v19  ;;  %v675_v23 = vsel %vm107_vm3, %v673_v19, %v672_v15  ;;  %v682_v24 = vsel %vm124_vm0, %v680_v17, %v681_v20  ;;  %v683_v25 = vsel %vm124_vm0, %v681_v20, %v680_v17  ;;  %v2582_v21 = vld [vmem:[%s2975_s3 + $0x3] ss:$0 sm:$0xff] }
 0x263   :  { %v2075_v26 = vpack.c.bf16 %v674_v22, %v675_v23  ;;  %v2078_v27 = vpack.c.bf16 %v683_v25, %v682_v24 }
 0x265   :  { %2076 = vmatmul.msk.bf16.vlgmr.msrb.gmra.mxu0 %vm2074_vm14, %v2075_v26  ;;  %2079 = vmatmul.msk.bf16.vlgmr.msra.gmra.mxu3 %vm2077_vm15, %v2078_v27 }
 0x266   :  { %1496 = vmatpush.bf16.msrb.mxu0 %v2520_v30  ;;  %v2536_v30 = vld [vmem:[#allocation2 + $0x378] sm:$0xff] }
 0x26a   :  { %1497 = vmatpush.bf16.msrb.mxu0 %v2519_v34  ;;  %v2532_v34 = vld [vmem:[#allocation2 + $0x358] sm:$0xff] }
 0x26e   :  { %1498 = vmatpush.bf16.msrb.mxu0 %v2518_v38  ;;  %v2541_v38 = vld [vmem:[#allocation2 + $0x3a0] sm:$0xff] }
 0x272   :  { %1499 = vmatpush.bf16.msrb.mxu0 %v2517_v48  ;;  %v2523_v48 = vld [vmem:[#allocation2 + $0x310] sm:$0xff] }
 0x2df   :  { %v910_v52 = vpop.f32.mrf.mxu1 }
 0x2e2   :  { %v896_v51 = vpop.f32.mrf.mxu0 }
 0x2e3   :  { %v897_v53 = vadd.f32 %v2581_v50, %v896_v51  ;;  %v2516_v51 = vld [vmem:[#allocation2 + $0x2d8] sm:$0xff] }
 0x2e4   :  { %1500 = vmatpush.bf16.msrb.mxu0 %v2516_v51  ;;  %v2522_v51 = vld [vmem:[#allocation2 + $0x308] sm:$0xff] }
 0x2e5   :  { %v911_v55 = vadd.f32 %v910_v52, %v897_v53  ;;  %v2505_v52 = vld [vmem:[#allocation2 + $0x280] sm:$0xff] }
 0x2e6   :  { %v2501_v53 = vld [vmem:[#allocation2 + $0x260] sm:$0xff] }
 0x2e7   :  { %v912_v59 = vpop.f32.mrf.mxu1 }
 0x2e8   :  { %v924_v54 = vpop.f32.mrf.mxu3 }
 0x2e9   :  { %v925_v58 = vadd.f32 %v924_v54, %v911_v55  ;;  %v2515_v54 = vld [vmem:[#allocation2 + $0x2d0] sm:$0xff]  ;;  %v2500_v55 = vld [vmem:[#allocation2 + $0x258] sm:$0xff] }
 0x2ea   :  { %v898_v56 = vpop.f32.mrf.mxu0  ;;  %1501 = vmatpush.bf16.msrb.mxu0 %v2515_v54 }
 0x2eb   :  { %v899_v57 = vadd.f32 %v2581_v50, %v898_v56  ;;  %v929_v61 = vmax.f32 %v925_v58, 0.0  ;;  %v2502_v50 = vld [vmem:[#allocation2 + $0x268] sm:$0xff]  ;;  %v2513_v58 = vld [vmem:[#allocation2 + $0x2c0] sm:$0xff] }
 0x2ec   :  { %1460 = vmatpush.bf16.msra.mxu2 %v2502_v50  ;;  %v2514_v56 = vld [vmem:[#allocation2 + $0x2c8] sm:$0xff] }
 0x2ed   :  { %v913_v60 = vadd.f32 %v912_v59, %v899_v57  ;;  %v931_v3 = vrot.slane %v929_v61, 7  ;;  %v937_v4 = vrot.slane %v929_v61, 1  ;;  %v2499_v57 = vld [vmem:[#allocation2 + $0x250] sm:$0xff]  ;;  %v2498_v59 = vld [vmem:[#allocation2 + $0x248] sm:$0xff] }
 0x2ee   :  { %1502 = vmatpush.bf16.msrb.mxu0 %v2514_v56 }
 0x2f0   :  { %v926_v62 = vpop.f32.mrf.mxu3  ;;  %1461 = vmatpush.bf16.msra.mxu2 %v2501_v53  ;;  %v2583_v53 = vld [vmem:[%s2975_s3 + $0x4] ss:$0 sm:$0xff] }
 0x2f1   :  { %v927_v63 = vadd.f32 %v926_v62, %v913_v60  ;;  %v2497_v60 = vld [vmem:[#allocation2 + $0x240] sm:$0xff] }
 0x2f2   :  { %1503 = vmatpush.bf16.msrb.mxu0 %v2513_v58 }
 0x2f3   :  { %v930_v0 = vmax.f32 %v927_v63, 0.0 }
 0x2f4   :  { %1462 = vmatpush.bf16.msra.mxu2 %v2500_v55  ;;  %v2521_v55 = vld [vmem:[#allocation2 + $0x300] sm:$0xff] }
 0x2f5   :  { %v932_v5 = vrot.slane %v930_v0, 7  ;;  %v938_v6 = vrot.slane %v930_v0, 1  ;;  %v944_v7 = vpack.c.bf16 %v930_v0, %v929_v61 }
 0x2f7   :  { %v933_v9 = vsel %vm107_vm3, %v931_v3, %v932_v5  ;;  %v934_v10 = vsel %vm107_vm3, %v932_v5, %v931_v3  ;;  %v939_v15 = vsel %vm124_vm0, %v937_v4, %v938_v6  ;;  %v940_v17 = vsel %vm124_vm0, %v938_v6, %v937_v4  ;;  %1166 = vmatmul.bf16.vlgmr.msra.gmra.mxu0 %v944_v7 }
 0x2f8   :  { %v2178_v19 = vpack.c.bf16 %v933_v9, %v934_v10  ;;  %v2181_v20 = vpack.c.bf16 %v940_v17, %v939_v15  ;;  %1463 = vmatpush.bf16.msra.mxu2 %v2499_v57  ;;  %1766 = vmatpush.bf16.msra.mxu0 %v2536_v30 }
 0x2fa   :  { %2179 = vmatmul.msk.bf16.vlgmr.msrb.gmra.mxu2 %vm2074_vm14, %v2178_v19  ;;  %2182 = vmatmul.msk.bf16.vlgmr.msrb.gmra.mxu1 %vm2077_vm15, %v2181_v20 }
 0x2fc   :  { %1464 = vmatpush.bf16.msra.mxu2 %v2498_v59 }
 0x300   :  { %1465 = vmatpush.bf16.msra.mxu2 %v2497_v60 }
 0x304   :  { %2545 = vmatpush.bf16.msrb.mxu2 %v2536_v30 }
 0x374   :  { %v1167_v22 = vpop.f32.mrf.mxu0 }
 0x377   :  { %v1181_v25 = vpop.f32.mrf.mxu1 }
 0x37c   :  { %v1169_v16 = vpop.f32.mrf.mxu0 }
 0x37d   :  { %v1153_v23 = vpop.f32.mrf.mxu2 }
 0x37e   :  { %v1154_v24 = vadd.f32 %v2582_v21, %v1153_v23 }
 0x37f   :  { %v1183_v35 = vpop.f32.mrf.mxu1 }
 0x380   :  { %v1168_v26 = vadd.f32 %v1167_v22, %v1154_v24 }
 0x382   :  { %v1182_v13 = vadd.f32 %v1181_v25, %v1168_v26 }
 0x384   :  { %v1186_v12 = vadd.f32 %v1182_v13, %v2786_v8  ;;  %v2510_v8 = vld [vmem:[#allocation2 + $0x2a8] sm:$0xff] }
 0x385   :  { %v1155_v27 = vpop.f32.mrf.mxu2  ;;  %1479 = vmatpush.bf16.msrb.mxu3 %v2510_v8  ;;  %v2531_v8 = vld [vmem:[#allocation2 + $0x350] sm:$0xff] }
 0x386   :  { %v1188_v29 = vmax.f32 %v1186_v12, 0.0  ;;  %v1156_v2 = vadd.f32 %v2582_v21, %v1155_v27 }
 0x388   :  { %1808 = vst [vmem:[%s2978_s6] sm:$0xff] %v1188_v29  ;;  %v1170_v33 = vadd.f32 %v1169_v16, %v1156_v2  ;;  %v2535_v16 = vld [vmem:[#allocation2 + $0x370] sm:$0xff] }
 0x389   :  { %1480 = vmatpush.bf16.msrb.mxu3 %v2509_v40  ;;  %1767 = vmatpush.bf16.msra.mxu0 %v2535_v16  ;;  %v2526_v40 = vld [vmem:[#allocation2 + $0x328] sm:$0xff] }
 0x38a   :  { %v1184_v36 = vadd.f32 %v1183_v35, %v1170_v33  ;;  %2546 = vmatpush.bf16.msrb.mxu2 %v2535_v16  ;;  %v2543_v33 = vld [vmem:[#allocation2 + $0x3b0] sm:$0xff]  ;;  %v2528_v35 = vld [vmem:[#allocation2 + $0x338] sm:$0xff] }
 0x38c   :  { %v1187_v37 = vadd.f32 %v1184_v36, %v2788_v11  ;;  %v2496_v11 = vld [vmem:[%s2977_s5 + $0x8] sm:$0xff] }
 0x38d   :  { %1481 = vmatpush.bf16.msrb.mxu3 %v2508_v43  ;;  %1768 = vmatpush.bf16.msra.mxu0 %v2534_v31  ;;  %v2542_v36 = vld [vmem:[#allocation2 + $0x3a8] sm:$0xff]  ;;  %v2525_v43 = vld [vmem:[#allocation2 + $0x320] sm:$0xff] }
 0x38e   :  { %v1189_v39 = vmax.f32 %v1187_v37, 0.0  ;;  %2547 = vmatpush.bf16.msrb.mxu2 %v2534_v31  ;;  %v2527_v37 = vld [vmem:[#allocation2 + $0x330] sm:$0xff] }
 0x390   :  { %1809 = vst [vmem:[%s2978_s6 + $0x8] sm:$0xff] %v1189_v39  ;;  %v1194_v41 = vpack.c.bf16 %v1189_v39, %v1188_v29  ;;  %v2530_v39 = vld [vmem:[#allocation2 + $0x348] sm:$0xff] }
 0x391   :  { %1482 = vmatpush.bf16.msrb.mxu3 %v2507_v44  ;;  %1769 = vmatpush.bf16.msra.mxu0 %v2533_v47  ;;  %v2524_v44 = vld [vmem:[#allocation2 + $0x318] sm:$0xff] }
 0x392   :  { %1218 = vmatpush.bf16.msra.mxu1 %v1194_v41  ;;  %2548 = vmatpush.bf16.msrb.mxu2 %v2533_v47  ;;  %v2540_v41 = vld [vmem:[#allocation2 + $0x398] sm:$0xff] }
 0x395   :  { %2191 = vmatmul.msk.bf16.vlgmr.msra.gmra.mxu1 %vm255_vm8, %v2495_v42  ;;  %1483 = vmatpush.bf16.msrb.mxu3 %v2506_v49  ;;  %v2529_v42 = vld [vmem:[#allocation2 + $0x340] sm:$0xff] }
 0x396   :  { %1770 = vmatpush.bf16.msra.mxu0 %v2532_v34  ;;  %2549 = vmatpush.bf16.msrb.mxu2 %v2532_v34  ;;  %v2537_v49 = vld [vmem:[#allocation2 + $0x380] sm:$0xff] }
 0x397   :  { %1747 = vmatpush.bf16.msrb.mxu1 %v2528_v35 }
 0x399   :  { %1484 = vmatpush.bf16.msrb.mxu3 %v2505_v52 }
 0x39a   :  { %1771 = vmatpush.bf16.msra.mxu0 %v2531_v8  ;;  %2550 = vmatpush.bf16.msrb.mxu2 %v2531_v8 }
 0x39b   :  { %1748 = vmatpush.bf16.msrb.mxu1 %v2527_v37 }
 0x39d   :  { %1785 = vmatpush.bf16.msra.mxu3 %v2544_v32 }
 0x39e   :  { %1772 = vmatpush.bf16.msra.mxu0 %v2530_v39  ;;  %2551 = vmatpush.bf16.msrb.mxu2 %v2530_v39 }
 0x39f   :  { %1749 = vmatpush.bf16.msrb.mxu1 %v2526_v40 }
 0x3a1   :  { %1786 = vmatpush.bf16.msra.mxu3 %v2543_v33 }
 0x3a2   :  { %1773 = vmatpush.bf16.msra.mxu0 %v2529_v42  ;;  %2552 = vmatpush.bf16.msrb.mxu2 %v2529_v42 }
 0x3a3   :  { %1750 = vmatpush.bf16.msrb.mxu1 %v2525_v43 }
 0x3a5   :  { %2192 = vmatmul.msk.bf16.gmra.mxu1 %vm255_vm8, %v2496_v11  ;;  %vm2911_vm8 = vmpackc.low %vm2699_vm2, %vm2624_vm6  ;;  %1787 = vmatpush.bf16.msra.mxu3 %v2542_v36  ;;  %v2539_v11 = vld [vmem:[#allocation2 + $0x390] sm:$0xff] }
 0x3a7   :  { %1751 = vmatpush.bf16.msrb.mxu1 %v2524_v44 }
 0x3a9   :  { %1788 = vmatpush.bf16.msra.mxu3 %v2541_v38 }
 0x3ab   :  { %1752 = vmatpush.bf16.msrb.mxu1 %v2523_v48 }
 0x3ad   :  { %1789 = vmatpush.bf16.msra.mxu3 %v2540_v41 }
 0x3af   :  { %1753 = vmatpush.bf16.msrb.mxu1 %v2522_v51 }
 0x3b1   :  { %1790 = vmatpush.bf16.msra.mxu3 %v2539_v11 }
 0x3b3   :  { %1754 = vmatpush.bf16.msrb.mxu1 %v2521_v55 }
 0x3b5   :  { %1791 = vmatpush.bf16.msra.mxu3 %v2538_v45 }
 0x3b9   :  { %1792 = vmatpush.bf16.msra.mxu3 %v2537_v49 }
 0x412   :  { %v1220_v61 = vpop.f32.mrf.mxu1 }
 0x413   :  { %v1242_v4 = vrot.slane %v1220_v61, 1  ;;  %v1230_v19 = vrot.slane %v1220_v61, 7 }
 0x41a   :  { %v1222_v62 = vpop.f32.mrf.mxu1 }
 0x41b   :  { %v1255_v63 = vpack.c.bf16 %v1222_v62, %v1220_v61  ;;  %v1243_v0 = vrot.slane %v1222_v62, 1  ;;  %v1231_v15 = vrot.slane %v1222_v62, 7 }
 0x41d   :  { %1485 = vmatmul.bf16.vlgmr.msrb.gmra.mxu3 %v1255_v63  ;;  %v1248_v6 = vsel %vm124_vm0, %v1242_v4, %v1243_v0  ;;  %v1236_v22 = vsel %vm107_vm3, %v1230_v19, %v1231_v15 }
 0x422   :  { %v1225_v3 = vpop.f32.mrf.mxu1 }
 0x423   :  { %v1244_v5 = vrot.slane %v1225_v3, 1  ;;  %v1232_v27 = vrot.slane %v1225_v3, 7 }
 0x425   :  { %v1247_v7 = vsel %vm124_vm0, %v1243_v0, %v1244_v5  ;;  %v1235_v29 = vsel %vm107_vm3, %v1231_v15, %v1232_v27 }
 0x426   :  { %v2297_v10 = vpack.c.bf16 %v1247_v7, %v1248_v6 }
 0x428   :  { %2298 = vmatmul.msk.bf16.vlgmr.msrb.gmra.mxu0 %vm2885_vm7, %v2297_v10 }
 0x42a   :  { %v1227_v17 = vpop.f32.mrf.mxu1 }
 0x42b   :  { %v1233_v20 = vrot.slane %v1227_v17, 7  ;;  %v1258_v21 = vpack.c.bf16 %v1227_v17, %v1225_v3  ;;  %v1245_v25 = vrot.slane %v1227_v17, 1 }
 0x42d   :  { %v1237_v23 = vsel %vm107_vm3, %v1233_v20, %v1230_v19  ;;  %1490 = vmatmul.bf16.gmra.mxu3 %v1258_v21  ;;  %v1246_v26 = vsel %vm124_vm0, %v1244_v5, %v1245_v25  ;;  %v1249_v13 = vsel %vm124_vm0, %v1245_v25, %v1242_v4  ;;  %v1234_v28 = vsel %vm107_vm3, %v1232_v27, %v1233_v20 }
 0x42e   :  { %v2291_v24 = vpack.c.bf16 %v1236_v22, %v1237_v23  ;;  %v2300_v12 = vpack.c.bf16 %v1249_v13, %v1246_v26  ;;  %v2294_v2 = vpack.c.bf16 %v1234_v28, %v1235_v29 }
 0x430   :  { %2292 = vmatmul.msk.bf16.vlgmr.msra.gmra.mxu2 %vm2898_vm1, %v2291_v24 }
 0x438   :  { %2301 = vmatmul.msk.bf16.gmra.mxu0 %vm2911_vm8, %v2300_v12 }
 0x440   :  { %2295 = vmatmul.msk.bf16.gmra.mxu2 %vm2924_vm4, %v2294_v2 }
 0x4a0   :  { %v1486_v50 = vpop.f32.mrf.mxu3 }
 0x4a5   :  { %v1505_v52 = vpop.f32.mrf.mxu0 }
 0x4a8   :  { %v1488_v57 = vpop.f32.mrf.mxu3 }
 0x4ad   :  { %v1507_v59 = vpop.f32.mrf.mxu0 }
 0x4b0   :  { %v1491_v5 = vpop.f32.mrf.mxu3 }
 0x4b3   :  { %v1467_v54 = vpop.f32.mrf.mxu2 }
 0x4b4   :  { %v1468_v56 = vadd.f32 %v2583_v53, %v1467_v54 }
 0x4b5   :  { %v1510_v15 = vpop.f32.mrf.mxu0 }
 0x4b6   :  { %v1487_v58 = vadd.f32 %v1486_v50, %v1468_v56 }
 0x4b8   :  { %v1506_v62 = vadd.f32 %v1505_v52, %v1487_v58  ;;  %v1493_v26 = vpop.f32.mrf.mxu3 }
 0x4ba   :  { %v1515_v3 = vmax.f32 %v1506_v62, 0.0 }
 0x4bb   :  { %v1469_v60 = vpop.f32.mrf.mxu2 }
 0x4bc   :  { %v1470_v61 = vadd.f32 %v2583_v53, %v1469_v60  ;;  %v1531_v23 = vrot.slane %v1515_v3, 1  ;;  %v1519_v31 = vrot.slane %v1515_v3, 7 }
 0x4bd   :  { %v1512_v28 = vpop.f32.mrf.mxu0 }
 0x4be   :  { %v1489_v63 = vadd.f32 %v1488_v57, %v1470_v61 }
 0x4c0   :  { %v1508_v0 = vadd.f32 %v1507_v59, %v1489_v63 }
 0x4c2   :  { %v1516_v4 = vmax.f32 %v1508_v0, 0.0 }
 0x4c3   :  { %v1472_v6 = vpop.f32.mrf.mxu2 }
 0x4c4   :  { %v1473_v7 = vadd.f32 %v2583_v53, %v1472_v6  ;;  %v1544_v10 = vpack.c.bf16 %v1516_v4, %v1515_v3  ;;  %v1532_v20 = vrot.slane %v1516_v4, 1  ;;  %v1520_v30 = vrot.slane %v1516_v4, 7 }
 0x4c6   :  { %v1492_v17 = vadd.f32 %v1491_v5, %v1473_v7  ;;  %1774 = vmatmul.bf16.vlgmr.msra.gmra.mxu0 %v1544_v10  ;;  %v1537_v27 = vsel %vm124_vm0, %v1531_v23, %v1532_v20  ;;  %v1525_v33 = vsel %vm107_vm3, %v1519_v31, %v1520_v30 }
 0x4c8   :  { %v1511_v19 = vadd.f32 %v1510_v15, %v1492_v17 }
 0x4ca   :  { %v1517_v21 = vmax.f32 %v1511_v19, 0.0 }
 0x4cb   :  { %v1474_v22 = vpop.f32.mrf.mxu2 }
 0x4cc   :  { %v1533_v24 = vrot.slane %v1517_v21, 1  ;;  %v1475_v25 = vadd.f32 %v2583_v53, %v1474_v22  ;;  %v1521_v38 = vrot.slane %v1517_v21, 7 }
 0x4ce   :  { %v1494_v13 = vadd.f32 %v1493_v26, %v1475_v25  ;;  %v1536_v12 = vsel %vm124_vm0, %v1532_v20, %v1533_v24  ;;  %v1524_v40 = vsel %vm107_vm3, %v1520_v30, %v1521_v38 }
 0x4cf   :  { %v2406_v29 = vpack.c.bf16 %v1536_v12, %v1537_v27 }
 0x4d0   :  { %v1513_v2 = vadd.f32 %v1512_v28, %v1494_v13 }
 0x4d1   :  { %2407 = vmatmul.msk.bf16.vlgmr.msra.gmra.mxu3 %vm2885_vm7, %v2406_v29 }
 0x4d2   :  { %v1518_v16 = vmax.f32 %v1513_v2, 0.0 }
 0x4d4   :  { %v1522_v32 = vrot.slane %v1518_v16, 7  ;;  %v1547_v47 = vpack.c.bf16 %v1518_v16, %v1517_v21  ;;  %v1534_v36 = vrot.slane %v1518_v16, 1 }
 0x4d6   :  { %1779 = vmatmul.bf16.vlgmr.msrb.gmra.mxu2 %v1547_v47  ;;  %v1526_v34 = vsel %vm107_vm3, %v1522_v32, %v1519_v31  ;;  %v1535_v9 = vsel %vm124_vm0, %v1533_v24, %v1534_v36  ;;  %v1538_v8 = vsel %vm124_vm0, %v1534_v36, %v1531_v23  ;;  %v1523_v39 = vsel %vm107_vm3, %v1521_v38, %v1522_v32 }
 0x4d7   :  { %v2400_v35 = vpack.c.bf16 %v1525_v33, %v1526_v34  ;;  %v2409_v37 = vpack.c.bf16 %v1538_v8, %v1535_v9  ;;  %v2403_v41 = vpack.c.bf16 %v1523_v39, %v1524_v40 }
 0x4d9   :  { %2401 = vmatmul.msk.bf16.vlgmr.msrb.gmra.mxu1 %vm2898_vm1, %v2400_v35 }
 0x4e1   :  { %2410 = vmatmul.msk.bf16.gmra.mxu3 %vm2911_vm8, %v2409_v37 }
 0x4e9   :  { %2404 = vmatmul.msk.bf16.gmra.mxu1 %vm2924_vm4, %v2403_v41 }
 0x543   :  { %v1775_v43 = vpop.f32.mrf.mxu0 }
 0x54b   :  { %v1777_v1 = vpop.f32.mrf.mxu0 }
 0x554   :  { %v1794_v42 = vpop.f32.mrf.mxu3 }
 0x556   :  { %v1756_v11 = vpop.f32.mrf.mxu1 }
 0x557   :  { %v1757_v46 = vadd.f32 %v2584_v14, %v1756_v11 }
 0x559   :  { %v1776_v44 = vadd.f32 %v1775_v43, %v1757_v46  ;;  %v1780_v18 = vpop.f32.mrf.mxu2 }
 0x55b   :  { %v1795_v45 = vadd.f32 %v1794_v42, %v1776_v44 }
 0x55c   :  { %v1796_v48 = vpop.f32.mrf.mxu3 }
 0x55d   :  { %2585 = vtanh.f32 %v1795_v45 }
 0x55e   :  { %v1758_v49 = vpop.f32.mrf.mxu1 }
 0x55f   :  { %v1759_v50 = vadd.f32 %v2584_v14, %v1758_v49 }
 0x561   :  { %v1778_v51 = vadd.f32 %v1777_v1, %v1759_v50  ;;  %v1782_v62 = vpop.f32.mrf.mxu2 }
 0x563   :  { %v2586_v52 = vpop.eup %2585  ;;  %v1797_v53 = vadd.f32 %v1796_v48, %v1778_v51 }
 0x564   :  { %1810 = vst [vmem:[%s2979_s7] sm:$0xff] %v2586_v52  ;;  %v1799_v56 = vpop.f32.mrf.mxu3 }
 0x565   :  { %2587 = vtanh.f32 %v1797_v53 }
 0x566   :  { %v1761_v54 = vpop.f32.mrf.mxu1 }
 0x567   :  { %v1762_v55 = vadd.f32 %v2584_v14, %v1761_v54 }
 0x569   :  { %v1781_v57 = vadd.f32 %v1780_v18, %v1762_v55 }
 0x56b   :  { %v2588_v58 = vpop.eup %2587  ;;  %v1800_v59 = vadd.f32 %v1799_v56, %v1781_v57 }
 0x56c   :  { %1811 = vst [vmem:[%s2979_s7 + $0x8] sm:$0xff] %v2588_v58  ;;  %v1801_v0 = vpop.f32.mrf.mxu3 }
 0x56d   :  { %2589 = vtanh.f32 %v1800_v59 }
 0x56e   :  { %v1763_v60 = vpop.f32.mrf.mxu1 }
 0x56f   :  { %v1764_v61 = vadd.f32 %v2584_v14, %v1763_v60 }
 0x571   :  { %v1783_v63 = vadd.f32 %v1782_v62, %v1764_v61 }
 0x573   :  { %v2590_v3 = vpop.eup %2589  ;;  %v1802_v4 = vadd.f32 %v1801_v0, %v1783_v63 }
 0x574   :  { %1812 = vst [vmem:[%s2979_s7 + $0x10] sm:$0xff] %v2590_v3 }
 0x575   :  { %2591 = vtanh.f32 %v1802_v4 }
 0x57b   :  { %v2592_v5 = vpop.eup %2591 }
 0x57c   :  { %1813 = vst [vmem:[%s2979_s7 + $0x18] sm:$0xff] %v2592_v5 }
 0x57d   :  { %1822 = vsyncpa [#allocation3], 1 }

</bundles_post_ra>
